<compile_context>
chip_gen: v5e
topology: v5e:2x2
jax: 0.10.0
libtpu: 0.0.40
codegen_flags: <defaults>
</compile_context>

<pallas_src>
import functools

import jax
import jax.numpy as jnp
from jax.experimental import pallas as pl
from jax.experimental.pallas import tpu as pltpu


def _fused_layers_kernel(
    x_ref, img_ref,
    wq_ref, bq_ref, wkv_ref, bv_ref, wo_ref, bo_ref, gamma_ref, beta_ref,
    out_ref,
    act_ref, oacc_ref,
    *, num_heads, head_dim, eps, compute_dtype):
  """Grid point = (batch block b, layer l).  act_ref carries the residual stream."""
  l = pl.program_id(1)
  exact_recip = jnp.dtype(compute_dtype) == jnp.dtype(jnp.float32)

  # Seed the f32 carry for this batch block.
  @pl.when(l == 0)
  def _():
    act_ref[...] = x_ref[...].astype(jnp.float32)

  bb, lq, d = act_ref.shape
  lk = img_ref.shape[1]
  scale = 1.0 / float(head_dim) ** 0.5

  xb = act_ref[...].reshape(bb * lq, d).astype(compute_dtype)
  imgb = img_ref[...].reshape(bb * lk, d).astype(compute_dtype)

  # Head-fused projections: full-width MXU matmuls with f32 accumulation.
  # Scale applied to the f32 result (NOT folded into the weights).
  q = (jnp.dot(xb, wq_ref[0], preferred_element_type=jnp.float32)
       + bq_ref[0]) * scale                                       # (bb*lq, d)
  kv = jnp.dot(imgb, wkv_ref[0], preferred_element_type=jnp.float32)  # (bb*lk, 2d)
  k = kv[:, :d]                        # K bias dropped: softmax cancels a per-row shift
  v = kv[:, d:] + bv_ref[0]

  q3 = q.reshape(bb, lq, d).astype(compute_dtype)
  k3 = k.reshape(bb, lk, d).astype(compute_dtype)
  v3 = v.reshape(bb, lk, d).astype(compute_dtype)

  # Per-head attention core; each head's output goes straight into the VMEM
  # scratch slab (bounded live set, no concatenate).
  # TODO(synk): when head_dim % 128 != 0 these lane slices cost per-head relayouts;
  # relayout q/k/v once to head-major for such configs.
  for h in range(num_heads):
    sl = slice(h * head_dim, (h + 1) * head_dim)
    s = jnp.einsum("bqe,bke->bqk", q3[:, :, sl], k3[:, :, sl],
                   preferred_element_type=jnp.float32)            # (bb, lq, lk) f32
    m = jnp.max(s, axis=-1, keepdims=True)
    p = jnp.exp(s - m)
    denom = jnp.sum(p, axis=-1, keepdims=True)
    if exact_recip:
      p = p / denom                                   # exact on the f32 parity path
    else:
      p = p * pl.reciprocal(denom, approx=True)       # EUP slot, nearly free
    oacc_ref[:, :, sl] = jnp.einsum("bqk,bke->bqe", p.astype(compute_dtype),
                                    v3[:, :, sl],
                                    preferred_element_type=jnp.float32)

  # One full-width out-projection + residual (carry re-read here, not held live
  # across the projections / head loop).
  o2 = oacc_ref[...].reshape(bb * lq, d).astype(compute_dtype)
  attn = jnp.dot(o2, wo_ref[0], preferred_element_type=jnp.float32) + bo_ref[0]
  y = attn.reshape(bb, lq, d) + act_ref[...]

  # LayerNorm over the hidden dim (one-pass stats, biased variance, eps in rsqrt).
  mean = jnp.mean(y, axis=-1, keepdims=True)
  var = jnp.maximum(jnp.mean(y * y, axis=-1, keepdims=True) - mean * mean, 0.0)
  y_norm = (y - mean) * jax.lax.rsqrt(var + eps)
  act_ref[...] = y_norm * gamma_ref[0] + beta_ref[0]

  # Only the last layer materializes the output block.
  @pl.when(l == pl.num_programs(1) - 1)
  def _():
    out_ref[...] = act_ref[...].astype(out_ref.dtype)


def _prepare_stacked_params(params, compute_dtype):
  """Stack per-layer params, fuse Wk|Wv, cast matmul weights to compute dtype."""
  stk = lambda key: jnp.stack([p[key] for p in params])
  wkv = jnp.concatenate([stk("wk"), stk("wv")], axis=-1)          # (L, D, 2D)
  # NOTE: bk is dropped — q.(k + bk) shifts every score in a softmax row by the
  # same constant, which softmax cancels exactly.
  return dict(
      wq=stk("wq").astype(compute_dtype),                         # (L, D, D)
      wkv=wkv.astype(compute_dtype),                              # (L, D, 2D)
      wo=stk("wo").astype(compute_dtype),                         # (L, D, D)
      bq=stk("bq").astype(jnp.float32)[:, None, :],               # (L, 1, D)
      bv=stk("bv").astype(jnp.float32)[:, None, :],
      bo=stk("bo").astype(jnp.float32)[:, None, :],
      gamma=stk("gamma").astype(jnp.float32)[:, None, :],
      beta=stk("beta").astype(jnp.float32)[:, None, :],
  )


def _vmem_capacity_bytes():
  try:
    cap = getattr(pltpu.get_tpu_info(), "vmem_capacity_bytes", None)
    if cap:
      return int(cap)
  except Exception:
    pass
  return 64 * 1024 * 1024       # conservative default (v7x per-TensorCore VMEM)


def multilayer_cross_attention_fusion(text_embeds, image_embeds, params, *,
                                      num_heads, eps=1e-5,
                                      compute_dtype=jnp.bfloat16, block_b=None):
  """x:(B,Lq,D), img:(B,Lk,D) -> (B,Lq,D).  All layers fused in one pallas_call."""
  B, Lq, D = text_embeds.shape
  _, Lk, _ = image_embeds.shape
  num_layers = len(params)
  assert D % num_heads == 0
  hd = D // num_heads
  # Lq/Lk multiples of 8 keep the (bb, L, D) <-> (bb*L, D) reshapes sublane no-ops.

  sp = _prepare_stacked_params(params, compute_dtype)

  c_item = jnp.dtype(compute_dtype).itemsize
  x_item = jnp.dtype(text_embeds.dtype).itemsize
  # Per-layer streamed weight set (double-buffered): Wq + Wkv + Wo + 5 f32 vectors.
  weight_bytes = 2 * (4 * D * D * c_item + 5 * D * 4)
  # VMEM bytes per unit of block_b: pipeline buffers, scratch carries, and the
  # main f32 / compute-dtype intermediates.
  per_b_bytes = (
      2 * Lq * D * x_item            # text block (double-buffered)
      + 2 * Lk * D * x_item          # image block (double-buffered)
      + 2 * Lq * D * x_item          # output block (double-buffered)
      + 2 * Lq * D * 4               # act carry + head-output scratch (f32)
      + Lq * D * (4 + c_item)        # q (f32) + cast copy
      + Lk * 2 * D * (4 + c_item)    # kv (f32) + cast copies
      + 2 * Lq * Lk * 4              # per-head scores / probs (f32)
      + 3 * Lq * D * 4               # attn / residual / LayerNorm temporaries
  )
  vmem_cap = _vmem_capacity_bytes()

  if block_b is None:
    budget = int(vmem_cap * 0.7)
    cap_rows = max(1, (budget - weight_bytes) // per_b_bytes)
    # >= 2 batch blocks so the "parallel" axis can shard across v7x's two
    # TensorCores (free on single-TC v5e/v6e); otherwise maximize block_b so the
    # per-layer weights are re-streamed as few times as possible.
    hard_cap = min(cap_rows, B // 2) if B >= 2 else 1
    hard_cap = max(1, hard_cap)
    block_b = 1
    for cand in range(min(B, hard_cap), 0, -1):
      if B % cand == 0:
        block_b = cand
        break
  assert B % block_b == 0

  needed = weight_bytes + block_b * per_b_bytes + (4 << 20)
  vmem_limit = int(min(vmem_cap * 0.9, max(needed, 32 << 20)))

  kernel = functools.partial(_fused_layers_kernel, num_heads=num_heads,
                             head_dim=hd, eps=eps, compute_dtype=compute_dtype)

  mat_spec = lambda n: pl.BlockSpec((1, D, n), lambda b, l: (l, 0, 0))
  vec_spec = lambda: pl.BlockSpec((1, 1, D), lambda b, l: (l, 0, 0))

  return pl.pallas_call(
      kernel,
      out_shape=jax.ShapeDtypeStruct((B, Lq, D), text_embeds.dtype),
      grid=(B // block_b, num_layers),
      in_specs=[
          pl.BlockSpec((block_b, Lq, D), lambda b, l: (b, 0, 0)),   # text
          pl.BlockSpec((block_b, Lk, D), lambda b, l: (b, 0, 0)),   # image
          mat_spec(D), vec_spec(),        # wq, bq
          mat_spec(2 * D), vec_spec(),    # wkv, bv
          mat_spec(D), vec_spec(),        # wo, bo
          vec_spec(), vec_spec(),         # gamma, beta
      ],
      out_specs=pl.BlockSpec((block_b, Lq, D), lambda b, l: (b, 0, 0)),
      scratch_shapes=[pltpu.VMEM((block_b, Lq, D), jnp.float32),    # residual carry
                      pltpu.VMEM((block_b, Lq, D), jnp.float32)],   # head outputs
      compiler_params=pltpu.CompilerParams(
          dimension_semantics=("parallel", "arbitrary"),
          vmem_limit_bytes=vmem_limit),
  )(text_embeds, image_embeds,
    sp["wq"], sp["bq"], sp["wkv"], sp["bv"], sp["wo"], sp["bo"],
    sp["gamma"], sp["beta"])


# ------------------------- deterministic parameter init -------------------------

def init_params(key, hidden_dim, num_layers, num_heads):
  """Full-matrix params (used as y = x @ W), PyTorch-MHA-like init."""
  del num_heads
  limit = (6.0 / (2.0 * hidden_dim)) ** 0.5
  layers = []
  for i in range(num_layers):
    ks = jax.random.split(jax.random.fold_in(key, i), 10)
    u = lambda k: jax.random.uniform(k, (hidden_dim, hidden_dim), jnp.float32,
                                     -limit, limit)
    n = lambda k, s: jax.random.normal(k, (hidden_dim,), jnp.float32) * s
    layers.append(dict(
        wq=u(ks[0]), wk=u(ks[1]), wv=u(ks[2]), wo=u(ks[3]),
        bq=n(ks[4], 0.02), bk=n(ks[5], 0.02), bv=n(ks[6], 0.02), bo=n(ks[7], 0.02),
        gamma=1.0 + n(ks[8], 0.1), beta=n(ks[9], 0.1),
    ))
  return layers


# ------------------------- pure-JAX reference (for sanity) -------------------------

def _reference_layer(x, img, p, num_heads, eps=1e-5):
  B, Lq, D = x.shape
  Lk = img.shape[1]
  hd = D // num_heads
  scale = 1.0 / (hd ** 0.5)

  def heads(t, L):
    return t.reshape(B, L, num_heads, hd).transpose(0, 2, 1, 3)

  q = heads(x @ p["wq"] + p["bq"], Lq)
  k = heads(img @ p["wk"] + p["bk"], Lk)
  v = heads(img @ p["wv"] + p["bv"], Lk)
  s = jnp.einsum("bhqe,bhke->bhqk", q * scale, k)
  a = jax.nn.softmax(s, axis=-1)
  o = jnp.einsum("bhqk,bhke->bhqe", a, v)
  o = o.transpose(0, 2, 1, 3).reshape(B, Lq, D)
  y = o @ p["wo"] + p["bo"] + x
  mean = jnp.mean(y, axis=-1, keepdims=True)
  var = jnp.mean((y - mean) ** 2, axis=-1, keepdims=True)
  return (y - mean) * jax.lax.rsqrt(var + eps) * p["gamma"] + p["beta"]


def _reference(text_embeds, image_embeds, params, num_heads, eps=1e-5):
  x = text_embeds
  for p in params:
    x = _reference_layer(x, image_embeds, p, num_heads, eps)
  return x


if __name__ == "__main__":
  B, Lq, Lk, D = 2, 8, 16, 32
  NUM_LAYERS, NUM_HEADS = 2, 8

  key = jax.random.PRNGKey(0)
  k_text, k_img, k_params = jax.random.split(key, 3)
  text_embeds = jax.random.normal(k_text, (B, Lq, D), jnp.float32)
  image_embeds = jax.random.normal(k_img, (B, Lk, D), jnp.float32)
  params = init_params(k_params, D, NUM_LAYERS, NUM_HEADS)

  ref = jax.block_until_ready(
      _reference(text_embeds, image_embeds, params, NUM_HEADS))

  def _check(out, rel_tol, abs_tol, tag):
    assert out.shape == ref.shape, tag
    assert bool(jnp.isfinite(out).all()), f"{tag}: non-finite output"
    diff = (out.astype(jnp.float32) - ref).ravel()
    rel = float(jnp.sqrt(jnp.sum(diff * diff))
                / (jnp.sqrt(jnp.sum(jnp.square(ref.ravel()))) + 1e-12))
    mad = float(jnp.max(jnp.abs(diff)))
    assert rel < rel_tol and mad < abs_tol, f"{tag}: rel={rel:.3e} maxabs={mad:.3e}"

  # f32 compute path: checks the fused-kernel math.  Tolerances are sized for TPU
  # default (bf16-pass) matmul precision, used by both the kernel and the reference.
  out_f32 = jax.block_until_ready(multilayer_cross_attention_fusion(
      text_embeds, image_embeds, params, num_heads=NUM_HEADS,
      compute_dtype=jnp.float32))
  _check(out_f32, 3e-2, 0.15, "f32 kernel")

  # Default bf16-matmul path (MXU-friendly); looser bounds for bf16 operands +
  # approximate reciprocal in the softmax.
  out = jax.block_until_ready(multilayer_cross_attention_fusion(
      text_embeds, image_embeds, params, num_heads=NUM_HEADS))
  _check(out, 8e-2, 0.3, "bf16 kernel")

  print("KERNEL_OK")
</pallas_src>

<mosaic_0001>
module attributes {stable_mosaic.version = 11 : i64} {
  func.func @_fused_layers_kernel(%arg0: i32, %arg1: i32, %arg2: memref<1x8x32xf32, #tpu.memory_space<vmem>>, %arg3: memref<1x16x32xf32, #tpu.memory_space<vmem>>, %arg4: memref<1x32x32xf32, #tpu.memory_space<vmem>>, %arg5: memref<1x1x32xf32, #tpu.memory_space<vmem>>, %arg6: memref<1x32x64xf32, #tpu.memory_space<vmem>>, %arg7: memref<1x1x32xf32, #tpu.memory_space<vmem>>, %arg8: memref<1x32x32xf32, #tpu.memory_space<vmem>>, %arg9: memref<1x1x32xf32, #tpu.memory_space<vmem>>, %arg10: memref<1x1x32xf32, #tpu.memory_space<vmem>>, %arg11: memref<1x1x32xf32, #tpu.memory_space<vmem>>, %arg12: memref<1x8x32xf32, #tpu.memory_space<vmem>>, %arg13: memref<1x8x32xf32, #tpu.memory_space<vmem>>, %arg14: memref<1x8x32xf32, #tpu.memory_space<vmem>>) attributes {dimension_semantics = [#tpu.dimension_semantics<parallel>, #tpu.dimension_semantics<arbitrary>], iteration_bounds = array<i64: 2, 2>, scalar_prefetch = 0 : i64, scratch_operands = 2 : i64, tpu.core_type = #tpu.core_type<tc>, window_params = [{transform_indices = @transform_0, window_bounds = array<i64: 1, 8, 32>}, {transform_indices = @transform_1, window_bounds = array<i64: 1, 16, 32>}, {transform_indices = @transform_2, window_bounds = array<i64: 1, 32, 32>}, {transform_indices = @transform_3, window_bounds = array<i64: 1, 1, 32>}, {transform_indices = @transform_4, window_bounds = array<i64: 1, 32, 64>}, {transform_indices = @transform_5, window_bounds = array<i64: 1, 1, 32>}, {transform_indices = @transform_6, window_bounds = array<i64: 1, 32, 32>}, {transform_indices = @transform_7, window_bounds = array<i64: 1, 1, 32>}, {transform_indices = @transform_8, window_bounds = array<i64: 1, 1, 32>}, {transform_indices = @transform_9, window_bounds = array<i64: 1, 1, 32>}, {transform_indices = @transform_10, window_bounds = array<i64: 1, 8, 32>}]} {
    %c0_i32 = arith.constant 0 : i32
    %0 = arith.cmpi eq, %arg1, %c0_i32 : i32
    %1 = arith.extui %0 : i1 to i32
    %c0_i32_0 = arith.constant 0 : i32
    %2 = arith.cmpi ne, %1, %c0_i32_0 : i32
    scf.if %2 {
      %c0_98 = arith.constant 0 : index
      %c0_99 = arith.constant 0 : index
      %c0_100 = arith.constant 0 : index
      %194 = vector.load %arg2[%c0_98, %c0_99, %c0_100] : memref<1x8x32xf32, #tpu.memory_space<vmem>>, vector<1x8x32xf32>
      %c0_101 = arith.constant 0 : index
      %c0_102 = arith.constant 0 : index
      %c0_103 = arith.constant 0 : index
      %195 = vector.load %arg13[%c0_101, %c0_102, %c0_103] : memref<1x8x32xf32, #tpu.memory_space<vmem>>, vector<1x8x32xf32>
      tpu.vector_store %arg13[%c0_101, %c0_102, %c0_103], %194 {strides = array<i32>} : memref<1x8x32xf32, #tpu.memory_space<vmem>>, vector<1x8x32xf32>,
    } else {
    }
    %c0 = arith.constant 0 : index
    %c0_1 = arith.constant 0 : index
    %c0_2 = arith.constant 0 : index
    %3 = vector.load %arg13[%c0, %c0_1, %c0_2] : memref<1x8x32xf32, #tpu.memory_space<vmem>>, vector<1x8x32xf32>
    %4 = vector.shape_cast %3 : vector<1x8x32xf32> to vector<8x32xf32>
    %c0_3 = arith.constant 0 : index
    %c0_4 = arith.constant 0 : index
    %c0_5 = arith.constant 0 : index
    %5 = vector.load %arg3[%c0_3, %c0_4, %c0_5] : memref<1x16x32xf32, #tpu.memory_space<vmem>>, vector<1x16x32xf32>
    %6 = vector.shape_cast %5 : vector<1x16x32xf32> to vector<16x32xf32>
    %c0_6 = arith.constant 0 : index
    %c0_7 = arith.constant 0 : index
    %c0_8 = arith.constant 0 : index
    %7 = vector.load %arg4[%c0_6, %c0_7, %c0_8] : memref<1x32x32xf32, #tpu.memory_space<vmem>>, vector<1x32x32xf32>
    %8 = vector.shape_cast %7 : vector<1x32x32xf32> to vector<32x32xf32>
    %cst = arith.constant dense<0.000000e+00> : vector<8x32xf32>
    %9 = tpu.matmul %4, %8, %cst {dimension_numbers = #tpu.dot_dimension_numbers<[1], [0], [0], [1], [0, 0, 1, 1], [], []>} : vector<8x32xf32>, vector<32x32xf32>, vector<8x32xf32> -> vector<8x32xf32>
    %c0_9 = arith.constant 0 : index
    %c0_10 = arith.constant 0 : index
    %c0_11 = arith.constant 0 : index
    %10 = vector.load %arg5[%c0_9, %c0_10, %c0_11] : memref<1x1x32xf32, #tpu.memory_space<vmem>>, vector<1x1x32xf32>
    %11 = vector.shape_cast %10 : vector<1x1x32xf32> to vector<1x32xf32>
    %12 = vector.broadcast %11 : vector<1x32xf32> to vector<8x32xf32>
    %13 = arith.addf %9, %12 : vector<8x32xf32>
    %cst_12 = arith.constant 5.000000e-01 : f32
    %14 = vector.broadcast %cst_12 : f32 to vector<8x32xf32>
    %15 = arith.mulf %13, %14 : vector<8x32xf32>
    %c0_13 = arith.constant 0 : index
    %c0_14 = arith.constant 0 : index
    %c0_15 = arith.constant 0 : index
    %16 = vector.load %arg6[%c0_13, %c0_14, %c0_15] : memref<1x32x64xf32, #tpu.memory_space<vmem>>, vector<1x32x64xf32>
    %17 = vector.shape_cast %16 : vector<1x32x64xf32> to vector<32x64xf32>
    %cst_16 = arith.constant dense<0.000000e+00> : vector<16x64xf32>
    %18 = tpu.matmul %6, %17, %cst_16 {dimension_numbers = #tpu.dot_dimension_numbers<[1], [0], [0], [1], [0, 0, 1, 1], [], []>} : vector<16x32xf32>, vector<32x64xf32>, vector<16x64xf32> -> vector<16x64xf32>
    %19 = vector.extract_strided_slice %18 {offsets = [0, 0], sizes = [16, 32], strides = [1, 1]} : vector<16x64xf32> to vector<16x32xf32>
    %20 = vector.extract_strided_slice %18 {offsets = [0, 32], sizes = [16, 32], strides = [1, 1]} : vector<16x64xf32> to vector<16x32xf32>
    %c0_17 = arith.constant 0 : index
    %c0_18 = arith.constant 0 : index
    %c0_19 = arith.constant 0 : index
    %21 = vector.load %arg7[%c0_17, %c0_18, %c0_19] : memref<1x1x32xf32, #tpu.memory_space<vmem>>, vector<1x1x32xf32>
    %22 = vector.shape_cast %21 : vector<1x1x32xf32> to vector<1x32xf32>
    %23 = vector.broadcast %22 : vector<1x32xf32> to vector<16x32xf32>
    %24 = arith.addf %20, %23 : vector<16x32xf32>
    %25 = vector.shape_cast %15 : vector<8x32xf32> to vector<1x8x32xf32>
    %26 = vector.shape_cast %19 : vector<16x32xf32> to vector<1x16x32xf32>
    %27 = vector.shape_cast %24 : vector<16x32xf32> to vector<1x16x32xf32>
    %28 = vector.extract_strided_slice %25 {offsets = [0, 0, 0], sizes = [1, 8, 4], strides = [1, 1, 1]} : vector<1x8x32xf32> to vector<1x8x4xf32>
    %29 = vector.extract_strided_slice %26 {offsets = [0, 0, 0], sizes = [1, 16, 4], strides = [1, 1, 1]} : vector<1x16x32xf32> to vector<1x16x4xf32>
    "tpu.trace_start"() <{level = 10 : i32, message = "bqe,bke->bqk"}> : () -> ()
    %cst_20 = arith.constant dense<0.000000e+00> : vector<1x8x16xf32>
    %30 = tpu.matmul %28, %29, %cst_20 {dimension_numbers = #tpu.dot_dimension_numbers<[2], [2], [1], [1], [0, 0, 0, 1, 1, 1], [0], [0]>} : vector<1x8x4xf32>, vector<1x16x4xf32>, vector<1x8x16xf32> -> vector<1x8x16xf32>
    "tpu.trace_stop"() : () -> ()
    %cst_21 = arith.constant dense<0xFF800000> : vector<1x8xf32>
    %31 = vector.multi_reduction <maximumf>, %30, %cst_21 [2] : vector<1x8x16xf32> to vector<1x8xf32>
    %32 = vector.shape_cast %31 : vector<1x8xf32> to vector<1x8x1xf32>
    %33 = vector.broadcast %32 : vector<1x8x1xf32> to vector<1x8x16xf32>
    %34 = arith.subf %30, %33 : vector<1x8x16xf32>
    %35 = math.exp %34 : vector<1x8x16xf32>
    %cst_22 = arith.constant dense<0.000000e+00> : vector<1x8xf32>
    %36 = vector.multi_reduction <add>, %35, %cst_22 [2] : vector<1x8x16xf32> to vector<1x8xf32>
    %37 = vector.shape_cast %36 : vector<1x8xf32> to vector<1x8x1xf32>
    %38 = vector.broadcast %37 : vector<1x8x1xf32> to vector<1x8x16xf32>
    %39 = arith.divf %35, %38 : vector<1x8x16xf32>
    %40 = vector.extract_strided_slice %27 {offsets = [0, 0, 0], sizes = [1, 16, 4], strides = [1, 1, 1]} : vector<1x16x32xf32> to vector<1x16x4xf32>
    "tpu.trace_start"() <{level = 10 : i32, message = "bqk,bke->bqe"}> : () -> ()
    %cst_23 = arith.constant dense<0.000000e+00> : vector<1x8x4xf32>
    %41 = tpu.matmul %39, %40, %cst_23 {dimension_numbers = #tpu.dot_dimension_numbers<[2], [1], [1], [2], [0, 0, 0, 1, 1, 2], [0], [0]>} : vector<1x8x16xf32>, vector<1x16x4xf32>, vector<1x8x4xf32> -> vector<1x8x4xf32>
    "tpu.trace_stop"() : () -> ()
    %c0_24 = arith.constant 0 : index
    %c0_25 = arith.constant 0 : index
    %c0_26 = arith.constant 0 : index
    %42 = vector.load %arg14[%c0_24, %c0_25, %c0_26] : memref<1x8x32xf32, #tpu.memory_space<vmem>>, vector<1x8x4xf32>
    tpu.vector_store %arg14[%c0_24, %c0_25, %c0_26], %41 {strides = array<i32>} : memref<1x8x32xf32, #tpu.memory_space<vmem>>, vector<1x8x4xf32>,
    %43 = vector.extract_strided_slice %25 {offsets = [0, 0, 4], sizes = [1, 8, 4], strides = [1, 1, 1]} : vector<1x8x32xf32> to vector<1x8x4xf32>
    %44 = vector.extract_strided_slice %26 {offsets = [0, 0, 4], sizes = [1, 16, 4], strides = [1, 1, 1]} : vector<1x16x32xf32> to vector<1x16x4xf32>
    "tpu.trace_start"() <{level = 10 : i32, message = "bqe,bke->bqk"}> : () -> ()
    %cst_27 = arith.constant dense<0.000000e+00> : vector<1x8x16xf32>
    %45 = tpu.matmul %43, %44, %cst_27 {dimension_numbers = #tpu.dot_dimension_numbers<[2], [2], [1], [1], [0, 0, 0, 1, 1, 1], [0], [0]>} : vector<1x8x4xf32>, vector<1x16x4xf32>, vector<1x8x16xf32> -> vector<1x8x16xf32>
    "tpu.trace_stop"() : () -> ()
    %cst_28 = arith.constant dense<0xFF800000> : vector<1x8xf32>
    %46 = vector.multi_reduction <maximumf>, %45, %cst_28 [2] : vector<1x8x16xf32> to vector<1x8xf32>
    %47 = vector.shape_cast %46 : vector<1x8xf32> to vector<1x8x1xf32>
    %48 = vector.broadcast %47 : vector<1x8x1xf32> to vector<1x8x16xf32>
    %49 = arith.subf %45, %48 : vector<1x8x16xf32>
    %50 = math.exp %49 : vector<1x8x16xf32>
    %cst_29 = arith.constant dense<0.000000e+00> : vector<1x8xf32>
    %51 = vector.multi_reduction <add>, %50, %cst_29 [2] : vector<1x8x16xf32> to vector<1x8xf32>
    %52 = vector.shape_cast %51 : vector<1x8xf32> to vector<1x8x1xf32>
    %53 = vector.broadcast %52 : vector<1x8x1xf32> to vector<1x8x16xf32>
    %54 = arith.divf %50, %53 : vector<1x8x16xf32>
    %55 = vector.extract_strided_slice %27 {offsets = [0, 0, 4], sizes = [1, 16, 4], strides = [1, 1, 1]} : vector<1x16x32xf32> to vector<1x16x4xf32>
    "tpu.trace_start"() <{level = 10 : i32, message = "bqk,bke->bqe"}> : () -> ()
    %cst_30 = arith.constant dense<0.000000e+00> : vector<1x8x4xf32>
    %56 = tpu.matmul %54, %55, %cst_30 {dimension_numbers = #tpu.dot_dimension_numbers<[2], [1], [1], [2], [0, 0, 0, 1, 1, 2], [0], [0]>} : vector<1x8x16xf32>, vector<1x16x4xf32>, vector<1x8x4xf32> -> vector<1x8x4xf32>
    "tpu.trace_stop"() : () -> ()
    %c0_31 = arith.constant 0 : index
    %c0_32 = arith.constant 0 : index
    %c4 = arith.constant 4 : index
    %57 = vector.load %arg14[%c0_31, %c0_32, %c4] : memref<1x8x32xf32, #tpu.memory_space<vmem>>, vector<1x8x4xf32>
    tpu.vector_store %arg14[%c0_31, %c0_32, %c4], %56 {strides = array<i32>} : memref<1x8x32xf32, #tpu.memory_space<vmem>>, vector<1x8x4xf32>,
    %58 = vector.extract_strided_slice %25 {offsets = [0, 0, 8], sizes = [1, 8, 4], strides = [1, 1, 1]} : vector<1x8x32xf32> to vector<1x8x4xf32>
    %59 = vector.extract_strided_slice %26 {offsets = [0, 0, 8], sizes = [1, 16, 4], strides = [1, 1, 1]} : vector<1x16x32xf32> to vector<1x16x4xf32>
    "tpu.trace_start"() <{level = 10 : i32, message = "bqe,bke->bqk"}> : () -> ()
    %cst_33 = arith.constant dense<0.000000e+00> : vector<1x8x16xf32>
    %60 = tpu.matmul %58, %59, %cst_33 {dimension_numbers = #tpu.dot_dimension_numbers<[2], [2], [1], [1], [0, 0, 0, 1, 1, 1], [0], [0]>} : vector<1x8x4xf32>, vector<1x16x4xf32>, vector<1x8x16xf32> -> vector<1x8x16xf32>
    "tpu.trace_stop"() : () -> ()
    %cst_34 = arith.constant dense<0xFF800000> : vector<1x8xf32>
    %61 = vector.multi_reduction <maximumf>, %60, %cst_34 [2] : vector<1x8x16xf32> to vector<1x8xf32>
    %62 = vector.shape_cast %61 : vector<1x8xf32> to vector<1x8x1xf32>
    %63 = vector.broadcast %62 : vector<1x8x1xf32> to vector<1x8x16xf32>
    %64 = arith.subf %60, %63 : vector<1x8x16xf32>
    %65 = math.exp %64 : vector<1x8x16xf32>
    %cst_35 = arith.constant dense<0.000000e+00> : vector<1x8xf32>
    %66 = vector.multi_reduction <add>, %65, %cst_35 [2] : vector<1x8x16xf32> to vector<1x8xf32>
    %67 = vector.shape_cast %66 : vector<1x8xf32> to vector<1x8x1xf32>
    %68 = vector.broadcast %67 : vector<1x8x1xf32> to vector<1x8x16xf32>
    %69 = arith.divf %65, %68 : vector<1x8x16xf32>
    %70 = vector.extract_strided_slice %27 {offsets = [0, 0, 8], sizes = [1, 16, 4], strides = [1, 1, 1]} : vector<1x16x32xf32> to vector<1x16x4xf32>
    "tpu.trace_start"() <{level = 10 : i32, message = "bqk,bke->bqe"}> : () -> ()
    %cst_36 = arith.constant dense<0.000000e+00> : vector<1x8x4xf32>
    %71 = tpu.matmul %69, %70, %cst_36 {dimension_numbers = #tpu.dot_dimension_numbers<[2], [1], [1], [2], [0, 0, 0, 1, 1, 2], [0], [0]>} : vector<1x8x16xf32>, vector<1x16x4xf32>, vector<1x8x4xf32> -> vector<1x8x4xf32>
    "tpu.trace_stop"() : () -> ()
    %c0_37 = arith.constant 0 : index
    %c0_38 = arith.constant 0 : index
    %c8 = arith.constant 8 : index
    %72 = vector.load %arg14[%c0_37, %c0_38, %c8] : memref<1x8x32xf32, #tpu.memory_space<vmem>>, vector<1x8x4xf32>
    tpu.vector_store %arg14[%c0_37, %c0_38, %c8], %71 {strides = array<i32>} : memref<1x8x32xf32, #tpu.memory_space<vmem>>, vector<1x8x4xf32>,
    %73 = vector.extract_strided_slice %25 {offsets = [0, 0, 12], sizes = [1, 8, 4], strides = [1, 1, 1]} : vector<1x8x32xf32> to vector<1x8x4xf32>
    %74 = vector.extract_strided_slice %26 {offsets = [0, 0, 12], sizes = [1, 16, 4], strides = [1, 1, 1]} : vector<1x16x32xf32> to vector<1x16x4xf32>
    "tpu.trace_start"() <{level = 10 : i32, message = "bqe,bke->bqk"}> : () -> ()
    %cst_39 = arith.constant dense<0.000000e+00> : vector<1x8x16xf32>
    %75 = tpu.matmul %73, %74, %cst_39 {dimension_numbers = #tpu.dot_dimension_numbers<[2], [2], [1], [1], [0, 0, 0, 1, 1, 1], [0], [0]>} : vector<1x8x4xf32>, vector<1x16x4xf32>, vector<1x8x16xf32> -> vector<1x8x16xf32>
    "tpu.trace_stop"() : () -> ()
    %cst_40 = arith.constant dense<0xFF800000> : vector<1x8xf32>
    %76 = vector.multi_reduction <maximumf>, %75, %cst_40 [2] : vector<1x8x16xf32> to vector<1x8xf32>
    %77 = vector.shape_cast %76 : vector<1x8xf32> to vector<1x8x1xf32>
    %78 = vector.broadcast %77 : vector<1x8x1xf32> to vector<1x8x16xf32>
    %79 = arith.subf %75, %78 : vector<1x8x16xf32>
    %80 = math.exp %79 : vector<1x8x16xf32>
    %cst_41 = arith.constant dense<0.000000e+00> : vector<1x8xf32>
    %81 = vector.multi_reduction <add>, %80, %cst_41 [2] : vector<1x8x16xf32> to vector<1x8xf32>
    %82 = vector.shape_cast %81 : vector<1x8xf32> to vector<1x8x1xf32>
    %83 = vector.broadcast %82 : vector<1x8x1xf32> to vector<1x8x16xf32>
    %84 = arith.divf %80, %83 : vector<1x8x16xf32>
    %85 = vector.extract_strided_slice %27 {offsets = [0, 0, 12], sizes = [1, 16, 4], strides = [1, 1, 1]} : vector<1x16x32xf32> to vector<1x16x4xf32>
    "tpu.trace_start"() <{level = 10 : i32, message = "bqk,bke->bqe"}> : () -> ()
    %cst_42 = arith.constant dense<0.000000e+00> : vector<1x8x4xf32>
    %86 = tpu.matmul %84, %85, %cst_42 {dimension_numbers = #tpu.dot_dimension_numbers<[2], [1], [1], [2], [0, 0, 0, 1, 1, 2], [0], [0]>} : vector<1x8x16xf32>, vector<1x16x4xf32>, vector<1x8x4xf32> -> vector<1x8x4xf32>
    "tpu.trace_stop"() : () -> ()
    %c0_43 = arith.constant 0 : index
    %c0_44 = arith.constant 0 : index
    %c12 = arith.constant 12 : index
    %87 = vector.load %arg14[%c0_43, %c0_44, %c12] : memref<1x8x32xf32, #tpu.memory_space<vmem>>, vector<1x8x4xf32>
    tpu.vector_store %arg14[%c0_43, %c0_44, %c12], %86 {strides = array<i32>} : memref<1x8x32xf32, #tpu.memory_space<vmem>>, vector<1x8x4xf32>,
    %88 = vector.extract_strided_slice %25 {offsets = [0, 0, 16], sizes = [1, 8, 4], strides = [1, 1, 1]} : vector<1x8x32xf32> to vector<1x8x4xf32>
    %89 = vector.extract_strided_slice %26 {offsets = [0, 0, 16], sizes = [1, 16, 4], strides = [1, 1, 1]} : vector<1x16x32xf32> to vector<1x16x4xf32>
    "tpu.trace_start"() <{level = 10 : i32, message = "bqe,bke->bqk"}> : () -> ()
    %cst_45 = arith.constant dense<0.000000e+00> : vector<1x8x16xf32>
    %90 = tpu.matmul %88, %89, %cst_45 {dimension_numbers = #tpu.dot_dimension_numbers<[2], [2], [1], [1], [0, 0, 0, 1, 1, 1], [0], [0]>} : vector<1x8x4xf32>, vector<1x16x4xf32>, vector<1x8x16xf32> -> vector<1x8x16xf32>
    "tpu.trace_stop"() : () -> ()
    %cst_46 = arith.constant dense<0xFF800000> : vector<1x8xf32>
    %91 = vector.multi_reduction <maximumf>, %90, %cst_46 [2] : vector<1x8x16xf32> to vector<1x8xf32>
    %92 = vector.shape_cast %91 : vector<1x8xf32> to vector<1x8x1xf32>
    %93 = vector.broadcast %92 : vector<1x8x1xf32> to vector<1x8x16xf32>
    %94 = arith.subf %90, %93 : vector<1x8x16xf32>
    %95 = math.exp %94 : vector<1x8x16xf32>
    %cst_47 = arith.constant dense<0.000000e+00> : vector<1x8xf32>
    %96 = vector.multi_reduction <add>, %95, %cst_47 [2] : vector<1x8x16xf32> to vector<1x8xf32>
    %97 = vector.shape_cast %96 : vector<1x8xf32> to vector<1x8x1xf32>
    %98 = vector.broadcast %97 : vector<1x8x1xf32> to vector<1x8x16xf32>
    %99 = arith.divf %95, %98 : vector<1x8x16xf32>
    %100 = vector.extract_strided_slice %27 {offsets = [0, 0, 16], sizes = [1, 16, 4], strides = [1, 1, 1]} : vector<1x16x32xf32> to vector<1x16x4xf32>
    "tpu.trace_start"() <{level = 10 : i32, message = "bqk,bke->bqe"}> : () -> ()
    %cst_48 = arith.constant dense<0.000000e+00> : vector<1x8x4xf32>
    %101 = tpu.matmul %99, %100, %cst_48 {dimension_numbers = #tpu.dot_dimension_numbers<[2], [1], [1], [2], [0, 0, 0, 1, 1, 2], [0], [0]>} : vector<1x8x16xf32>, vector<1x16x4xf32>, vector<1x8x4xf32> -> vector<1x8x4xf32>
    "tpu.trace_stop"() : () -> ()
    %c0_49 = arith.constant 0 : index
    %c0_50 = arith.constant 0 : index
    %c16 = arith.constant 16 : index
    %102 = vector.load %arg14[%c0_49, %c0_50, %c16] : memref<1x8x32xf32, #tpu.memory_space<vmem>>, vector<1x8x4xf32>
    tpu.vector_store %arg14[%c0_49, %c0_50, %c16], %101 {strides = array<i32>} : memref<1x8x32xf32, #tpu.memory_space<vmem>>, vector<1x8x4xf32>,
    %103 = vector.extract_strided_slice %25 {offsets = [0, 0, 20], sizes = [1, 8, 4], strides = [1, 1, 1]} : vector<1x8x32xf32> to vector<1x8x4xf32>
    %104 = vector.extract_strided_slice %26 {offsets = [0, 0, 20], sizes = [1, 16, 4], strides = [1, 1, 1]} : vector<1x16x32xf32> to vector<1x16x4xf32>
    "tpu.trace_start"() <{level = 10 : i32, message = "bqe,bke->bqk"}> : () -> ()
    %cst_51 = arith.constant dense<0.000000e+00> : vector<1x8x16xf32>
    %105 = tpu.matmul %103, %104, %cst_51 {dimension_numbers = #tpu.dot_dimension_numbers<[2], [2], [1], [1], [0, 0, 0, 1, 1, 1], [0], [0]>} : vector<1x8x4xf32>, vector<1x16x4xf32>, vector<1x8x16xf32> -> vector<1x8x16xf32>
    "tpu.trace_stop"() : () -> ()
    %cst_52 = arith.constant dense<0xFF800000> : vector<1x8xf32>
    %106 = vector.multi_reduction <maximumf>, %105, %cst_52 [2] : vector<1x8x16xf32> to vector<1x8xf32>
    %107 = vector.shape_cast %106 : vector<1x8xf32> to vector<1x8x1xf32>
    %108 = vector.broadcast %107 : vector<1x8x1xf32> to vector<1x8x16xf32>
    %109 = arith.subf %105, %108 : vector<1x8x16xf32>
    %110 = math.exp %109 : vector<1x8x16xf32>
    %cst_53 = arith.constant dense<0.000000e+00> : vector<1x8xf32>
    %111 = vector.multi_reduction <add>, %110, %cst_53 [2] : vector<1x8x16xf32> to vector<1x8xf32>
    %112 = vector.shape_cast %111 : vector<1x8xf32> to vector<1x8x1xf32>
    %113 = vector.broadcast %112 : vector<1x8x1xf32> to vector<1x8x16xf32>
    %114 = arith.divf %110, %113 : vector<1x8x16xf32>
    %115 = vector.extract_strided_slice %27 {offsets = [0, 0, 20], sizes = [1, 16, 4], strides = [1, 1, 1]} : vector<1x16x32xf32> to vector<1x16x4xf32>
    "tpu.trace_start"() <{level = 10 : i32, message = "bqk,bke->bqe"}> : () -> ()
    %cst_54 = arith.constant dense<0.000000e+00> : vector<1x8x4xf32>
    %116 = tpu.matmul %114, %115, %cst_54 {dimension_numbers = #tpu.dot_dimension_numbers<[2], [1], [1], [2], [0, 0, 0, 1, 1, 2], [0], [0]>} : vector<1x8x16xf32>, vector<1x16x4xf32>, vector<1x8x4xf32> -> vector<1x8x4xf32>
    "tpu.trace_stop"() : () -> ()
    %c0_55 = arith.constant 0 : index
    %c0_56 = arith.constant 0 : index
    %c20 = arith.constant 20 : index
    %117 = vector.load %arg14[%c0_55, %c0_56, %c20] : memref<1x8x32xf32, #tpu.memory_space<vmem>>, vector<1x8x4xf32>
    tpu.vector_store %arg14[%c0_55, %c0_56, %c20], %116 {strides = array<i32>} : memref<1x8x32xf32, #tpu.memory_space<vmem>>, vector<1x8x4xf32>,
    %118 = vector.extract_strided_slice %25 {offsets = [0, 0, 24], sizes = [1, 8, 4], strides = [1, 1, 1]} : vector<1x8x32xf32> to vector<1x8x4xf32>
    %119 = vector.extract_strided_slice %26 {offsets = [0, 0, 24], sizes = [1, 16, 4], strides = [1, 1, 1]} : vector<1x16x32xf32> to vector<1x16x4xf32>
    "tpu.trace_start"() <{level = 10 : i32, message = "bqe,bke->bqk"}> : () -> ()
    %cst_57 = arith.constant dense<0.000000e+00> : vector<1x8x16xf32>
    %120 = tpu.matmul %118, %119, %cst_57 {dimension_numbers = #tpu.dot_dimension_numbers<[2], [2], [1], [1], [0, 0, 0, 1, 1, 1], [0], [0]>} : vector<1x8x4xf32>, vector<1x16x4xf32>, vector<1x8x16xf32> -> vector<1x8x16xf32>
    "tpu.trace_stop"() : () -> ()
    %cst_58 = arith.constant dense<0xFF800000> : vector<1x8xf32>
    %121 = vector.multi_reduction <maximumf>, %120, %cst_58 [2] : vector<1x8x16xf32> to vector<1x8xf32>
    %122 = vector.shape_cast %121 : vector<1x8xf32> to vector<1x8x1xf32>
    %123 = vector.broadcast %122 : vector<1x8x1xf32> to vector<1x8x16xf32>
    %124 = arith.subf %120, %123 : vector<1x8x16xf32>
    %125 = math.exp %124 : vector<1x8x16xf32>
    %cst_59 = arith.constant dense<0.000000e+00> : vector<1x8xf32>
    %126 = vector.multi_reduction <add>, %125, %cst_59 [2] : vector<1x8x16xf32> to vector<1x8xf32>
    %127 = vector.shape_cast %126 : vector<1x8xf32> to vector<1x8x1xf32>
    %128 = vector.broadcast %127 : vector<1x8x1xf32> to vector<1x8x16xf32>
    %129 = arith.divf %125, %128 : vector<1x8x16xf32>
    %130 = vector.extract_strided_slice %27 {offsets = [0, 0, 24], sizes = [1, 16, 4], strides = [1, 1, 1]} : vector<1x16x32xf32> to vector<1x16x4xf32>
    "tpu.trace_start"() <{level = 10 : i32, message = "bqk,bke->bqe"}> : () -> ()
    %cst_60 = arith.constant dense<0.000000e+00> : vector<1x8x4xf32>
    %131 = tpu.matmul %129, %130, %cst_60 {dimension_numbers = #tpu.dot_dimension_numbers<[2], [1], [1], [2], [0, 0, 0, 1, 1, 2], [0], [0]>} : vector<1x8x16xf32>, vector<1x16x4xf32>, vector<1x8x4xf32> -> vector<1x8x4xf32>
    "tpu.trace_stop"() : () -> ()
    %c0_61 = arith.constant 0 : index
    %c0_62 = arith.constant 0 : index
    %c24 = arith.constant 24 : index
    %132 = vector.load %arg14[%c0_61, %c0_62, %c24] : memref<1x8x32xf32, #tpu.memory_space<vmem>>, vector<1x8x4xf32>
    tpu.vector_store %arg14[%c0_61, %c0_62, %c24], %131 {strides = array<i32>} : memref<1x8x32xf32, #tpu.memory_space<vmem>>, vector<1x8x4xf32>,
    %133 = vector.extract_strided_slice %25 {offsets = [0, 0, 28], sizes = [1, 8, 4], strides = [1, 1, 1]} : vector<1x8x32xf32> to vector<1x8x4xf32>
    %134 = vector.extract_strided_slice %26 {offsets = [0, 0, 28], sizes = [1, 16, 4], strides = [1, 1, 1]} : vector<1x16x32xf32> to vector<1x16x4xf32>
    "tpu.trace_start"() <{level = 10 : i32, message = "bqe,bke->bqk"}> : () -> ()
    %cst_63 = arith.constant dense<0.000000e+00> : vector<1x8x16xf32>
    %135 = tpu.matmul %133, %134, %cst_63 {dimension_numbers = #tpu.dot_dimension_numbers<[2], [2], [1], [1], [0, 0, 0, 1, 1, 1], [0], [0]>} : vector<1x8x4xf32>, vector<1x16x4xf32>, vector<1x8x16xf32> -> vector<1x8x16xf32>
    "tpu.trace_stop"() : () -> ()
    %cst_64 = arith.constant dense<0xFF800000> : vector<1x8xf32>
    %136 = vector.multi_reduction <maximumf>, %135, %cst_64 [2] : vector<1x8x16xf32> to vector<1x8xf32>
    %137 = vector.shape_cast %136 : vector<1x8xf32> to vector<1x8x1xf32>
    %138 = vector.broadcast %137 : vector<1x8x1xf32> to vector<1x8x16xf32>
    %139 = arith.subf %135, %138 : vector<1x8x16xf32>
    %140 = math.exp %139 : vector<1x8x16xf32>
    %cst_65 = arith.constant dense<0.000000e+00> : vector<1x8xf32>
    %141 = vector.multi_reduction <add>, %140, %cst_65 [2] : vector<1x8x16xf32> to vector<1x8xf32>
    %142 = vector.shape_cast %141 : vector<1x8xf32> to vector<1x8x1xf32>
    %143 = vector.broadcast %142 : vector<1x8x1xf32> to vector<1x8x16xf32>
    %144 = arith.divf %140, %143 : vector<1x8x16xf32>
    %145 = vector.extract_strided_slice %27 {offsets = [0, 0, 28], sizes = [1, 16, 4], strides = [1, 1, 1]} : vector<1x16x32xf32> to vector<1x16x4xf32>
    "tpu.trace_start"() <{level = 10 : i32, message = "bqk,bke->bqe"}> : () -> ()
    %cst_66 = arith.constant dense<0.000000e+00> : vector<1x8x4xf32>
    %146 = tpu.matmul %144, %145, %cst_66 {dimension_numbers = #tpu.dot_dimension_numbers<[2], [1], [1], [2], [0, 0, 0, 1, 1, 2], [0], [0]>} : vector<1x8x16xf32>, vector<1x16x4xf32>, vector<1x8x4xf32> -> vector<1x8x4xf32>
    "tpu.trace_stop"() : () -> ()
    %c0_67 = arith.constant 0 : index
    %c0_68 = arith.constant 0 : index
    %c28 = arith.constant 28 : index
    %147 = vector.load %arg14[%c0_67, %c0_68, %c28] : memref<1x8x32xf32, #tpu.memory_space<vmem>>, vector<1x8x4xf32>
    tpu.vector_store %arg14[%c0_67, %c0_68, %c28], %146 {strides = array<i32>} : memref<1x8x32xf32, #tpu.memory_space<vmem>>, vector<1x8x4xf32>,
    %c0_69 = arith.constant 0 : index
    %c0_70 = arith.constant 0 : index
    %c0_71 = arith.constant 0 : index
    %148 = vector.load %arg14[%c0_69, %c0_70, %c0_71] : memref<1x8x32xf32, #tpu.memory_space<vmem>>, vector<1x8x32xf32>
    %149 = vector.shape_cast %148 : vector<1x8x32xf32> to vector<8x32xf32>
    %c0_72 = arith.constant 0 : index
    %c0_73 = arith.constant 0 : index
    %c0_74 = arith.constant 0 : index
    %150 = vector.load %arg8[%c0_72, %c0_73, %c0_74] : memref<1x32x32xf32, #tpu.memory_space<vmem>>, vector<1x32x32xf32>
    %151 = vector.shape_cast %150 : vector<1x32x32xf32> to vector<32x32xf32>
    %cst_75 = arith.constant dense<0.000000e+00> : vector<8x32xf32>
    %152 = tpu.matmul %149, %151, %cst_75 {dimension_numbers = #tpu.dot_dimension_numbers<[1], [0], [0], [1], [0, 0, 1, 1], [], []>} : vector<8x32xf32>, vector<32x32xf32>, vector<8x32xf32> -> vector<8x32xf32>
    %c0_76 = arith.constant 0 : index
    %c0_77 = arith.constant 0 : index
    %c0_78 = arith.constant 0 : index
    %153 = vector.load %arg9[%c0_76, %c0_77, %c0_78] : memref<1x1x32xf32, #tpu.memory_space<vmem>>, vector<1x1x32xf32>
    %154 = vector.shape_cast %153 : vector<1x1x32xf32> to vector<1x32xf32>
    %155 = vector.broadcast %154 : vector<1x32xf32> to vector<8x32xf32>
    %156 = arith.addf %152, %155 : vector<8x32xf32>
    %157 = vector.shape_cast %156 : vector<8x32xf32> to vector<1x8x32xf32>
    %c0_79 = arith.constant 0 : index
    %c0_80 = arith.constant 0 : index
    %c0_81 = arith.constant 0 : index
    %158 = vector.load %arg13[%c0_79, %c0_80, %c0_81] : memref<1x8x32xf32, #tpu.memory_space<vmem>>, vector<1x8x32xf32>
    %159 = arith.addf %157, %158 : vector<1x8x32xf32>
    %cst_82 = arith.constant dense<0.000000e+00> : vector<1x8xf32>
    %160 = vector.multi_reduction <add>, %159, %cst_82 [2] : vector<1x8x32xf32> to vector<1x8xf32>
    %161 = vector.shape_cast %160 : vector<1x8xf32> to vector<1x8x1xf32>
    %cst_83 = arith.constant 3.200000e+01 : f32
    %162 = vector.broadcast %cst_83 : f32 to vector<1x8x1xf32>
    %163 = arith.divf %161, %162 : vector<1x8x1xf32>
    %164 = arith.mulf %159, %159 : vector<1x8x32xf32>
    %cst_84 = arith.constant dense<0.000000e+00> : vector<1x8xf32>
    %165 = vector.multi_reduction <add>, %164, %cst_84 [2] : vector<1x8x32xf32> to vector<1x8xf32>
    %166 = vector.shape_cast %165 : vector<1x8xf32> to vector<1x8x1xf32>
    %cst_85 = arith.constant 3.200000e+01 : f32
    %167 = vector.broadcast %cst_85 : f32 to vector<1x8x1xf32>
    %168 = arith.divf %166, %167 : vector<1x8x1xf32>
    %169 = arith.mulf %163, %163 : vector<1x8x1xf32>
    %170 = arith.subf %168, %169 : vector<1x8x1xf32>
    %cst_86 = arith.constant 0.000000e+00 : f32
    %171 = vector.broadcast %cst_86 : f32 to vector<1x8x1xf32>
    %172 = arith.maximumf %170, %171 : vector<1x8x1xf32>
    %173 = vector.broadcast %163 : vector<1x8x1xf32> to vector<1x8x32xf32>
    %174 = arith.subf %159, %173 : vector<1x8x32xf32>
    %cst_87 = arith.constant 9.99999974E-6 : f32
    %175 = vector.broadcast %cst_87 : f32 to vector<1x8x1xf32>
    %176 = arith.addf %172, %175 : vector<1x8x1xf32>
    %177 = math.rsqrt %176 : vector<1x8x1xf32>
    %178 = vector.broadcast %177 : vector<1x8x1xf32> to vector<1x8x32xf32>
    %179 = arith.mulf %174, %178 : vector<1x8x32xf32>
    %c0_88 = arith.constant 0 : index
    %c0_89 = arith.constant 0 : index
    %c0_90 = arith.constant 0 : index
    %180 = vector.load %arg10[%c0_88, %c0_89, %c0_90] : memref<1x1x32xf32, #tpu.memory_space<vmem>>, vector<1x1x32xf32>
    %181 = vector.shape_cast %180 : vector<1x1x32xf32> to vector<1x32xf32>
    %182 = vector.shape_cast %181 : vector<1x32xf32> to vector<1x1x32xf32>
    %183 = vector.broadcast %182 : vector<1x1x32xf32> to vector<1x8x32xf32>
    %184 = arith.mulf %179, %183 : vector<1x8x32xf32>
    %c0_91 = arith.constant 0 : index
    %c0_92 = arith.constant 0 : index
    %c0_93 = arith.constant 0 : index
    %185 = vector.load %arg11[%c0_91, %c0_92, %c0_93] : memref<1x1x32xf32, #tpu.memory_space<vmem>>, vector<1x1x32xf32>
    %186 = vector.shape_cast %185 : vector<1x1x32xf32> to vector<1x32xf32>
    %187 = vector.shape_cast %186 : vector<1x32xf32> to vector<1x1x32xf32>
    %188 = vector.broadcast %187 : vector<1x1x32xf32> to vector<1x8x32xf32>
    %189 = arith.addf %184, %188 : vector<1x8x32xf32>
    %c0_94 = arith.constant 0 : index
    %c0_95 = arith.constant 0 : index
    %c0_96 = arith.constant 0 : index
    %190 = vector.load %arg13[%c0_94, %c0_95, %c0_96] : memref<1x8x32xf32, #tpu.memory_space<vmem>>, vector<1x8x32xf32>
    tpu.vector_store %arg13[%c0_94, %c0_95, %c0_96], %189 {strides = array<i32>} : memref<1x8x32xf32, #tpu.memory_space<vmem>>, vector<1x8x32xf32>,
    %c1_i32 = arith.constant 1 : i32
    %191 = arith.cmpi eq, %arg1, %c1_i32 : i32
    %192 = arith.extui %191 : i1 to i32
    %c0_i32_97 = arith.constant 0 : i32
    %193 = arith.cmpi ne, %192, %c0_i32_97 : i32
    scf.if %193 {
      %c0_98 = arith.constant 0 : index
      %c0_99 = arith.constant 0 : index
      %c0_100 = arith.constant 0 : index
      %194 = vector.load %arg13[%c0_98, %c0_99, %c0_100] : memref<1x8x32xf32, #tpu.memory_space<vmem>>, vector<1x8x32xf32>
      %c0_101 = arith.constant 0 : index
      %c0_102 = arith.constant 0 : index
      %c0_103 = arith.constant 0 : index
      %195 = vector.load %arg12[%c0_101, %c0_102, %c0_103] : memref<1x8x32xf32, #tpu.memory_space<vmem>>, vector<1x8x32xf32>
      tpu.vector_store %arg12[%c0_101, %c0_102, %c0_103], %194 {strides = array<i32>} : memref<1x8x32xf32, #tpu.memory_space<vmem>>, vector<1x8x32xf32>,
    } else {
    }
    return
  }
  func.func @transform_0(%arg0: i32, %arg1: i32) -> (i32, i32, i32) {
    %c0_i32 = arith.constant 0 : i32
    %c0_i32_0 = arith.constant 0 : i32
    %c0_i32_1 = arith.constant 0 : i32
    return %arg0, %c0_i32, %c0_i32_0 : i32, i32, i32
  }
  func.func @transform_1(%arg0: i32, %arg1: i32) -> (i32, i32, i32) {
    %c0_i32 = arith.constant 0 : i32
    %c0_i32_0 = arith.constant 0 : i32
    %c0_i32_1 = arith.constant 0 : i32
    return %arg0, %c0_i32, %c0_i32_0 : i32, i32, i32
  }
  func.func @transform_2(%arg0: i32, %arg1: i32) -> (i32, i32, i32) {
    %c0_i32 = arith.constant 0 : i32
    %c0_i32_0 = arith.constant 0 : i32
    %c0_i32_1 = arith.constant 0 : i32
    return %arg1, %c0_i32, %c0_i32_0 : i32, i32, i32
  }
  func.func @transform_3(%arg0: i32, %arg1: i32) -> (i32, i32, i32) {
    %c0_i32 = arith.constant 0 : i32
    %c0_i32_0 = arith.constant 0 : i32
    %c0_i32_1 = arith.constant 0 : i32
    return %arg1, %c0_i32, %c0_i32_0 : i32, i32, i32
  }
  func.func @transform_4(%arg0: i32, %arg1: i32) -> (i32, i32, i32) {
    %c0_i32 = arith.constant 0 : i32
    %c0_i32_0 = arith.constant 0 : i32
    %c0_i32_1 = arith.constant 0 : i32
    return %arg1, %c0_i32, %c0_i32_0 : i32, i32, i32
  }
  func.func @transform_5(%arg0: i32, %arg1: i32) -> (i32, i32, i32) {
    %c0_i32 = arith.constant 0 : i32
    %c0_i32_0 = arith.constant 0 : i32
    %c0_i32_1 = arith.constant 0 : i32
    return %arg1, %c0_i32, %c0_i32_0 : i32, i32, i32
  }
  func.func @transform_6(%arg0: i32, %arg1: i32) -> (i32, i32, i32) {
    %c0_i32 = arith.constant 0 : i32
    %c0_i32_0 = arith.constant 0 : i32
    %c0_i32_1 = arith.constant 0 : i32
    return %arg1, %c0_i32, %c0_i32_0 : i32, i32, i32
  }
  func.func @transform_7(%arg0: i32, %arg1: i32) -> (i32, i32, i32) {
    %c0_i32 = arith.constant 0 : i32
    %c0_i32_0 = arith.constant 0 : i32
    %c0_i32_1 = arith.constant 0 : i32
    return %arg1, %c0_i32, %c0_i32_0 : i32, i32, i32
  }
  func.func @transform_8(%arg0: i32, %arg1: i32) -> (i32, i32, i32) {
    %c0_i32 = arith.constant 0 : i32
    %c0_i32_0 = arith.constant 0 : i32
    %c0_i32_1 = arith.constant 0 : i32
    return %arg1, %c0_i32, %c0_i32_0 : i32, i32, i32
  }
  func.func @transform_9(%arg0: i32, %arg1: i32) -> (i32, i32, i32) {
    %c0_i32 = arith.constant 0 : i32
    %c0_i32_0 = arith.constant 0 : i32
    %c0_i32_1 = arith.constant 0 : i32
    return %arg1, %c0_i32, %c0_i32_0 : i32, i32, i32
  }
  func.func @transform_10(%arg0: i32, %arg1: i32) -> (i32, i32, i32) {
    %c0_i32 = arith.constant 0 : i32
    %c0_i32_0 = arith.constant 0 : i32
    %c0_i32_1 = arith.constant 0 : i32
    return %arg0, %c0_i32, %c0_i32_0 : i32, i32, i32
  }
}

</mosaic_0001>

<bundles_post_ra>
// kernel: tpu_custom_call.1
= control target key start
LH: loop header
LB: loop body
LE: loop exit
PB: predicated region body
PF: predicated region fallthrough
CT: control target
= control target key end

     0   :  { %s3009_s0 = inlined_call_operand.hbm [shape: f32[2,8,32], index: 0, kind: input, shape index: {}]   ;;  %s3010_s1 = inlined_call_operand.hbm [shape: f32[2,16,32], index: 1, kind: input, shape index: {}]   ;;  %s3011_s2 = inlined_call_operand.hbm [shape: f32[2,32,32], index: 2, kind: input, shape index: {}]   ;;  %s3012_s3 = inlined_call_operand.vmem [shape: f32[2,1,32], index: 3, kind: input, shape index: {}]   ;;  %s3013_s4 = inlined_call_operand.hbm [shape: f32[2,32,64], index: 4, kind: input, shape index: {}]   ;;  %s3014_s5 = inlined_call_operand.vmem [shape: f32[2,1,32], index: 5, kind: input, shape index: {}]   ;;  %s3015_s6 = inlined_call_operand.hbm [shape: f32[2,32,32], index: 6, kind: input, shape index: {}]   ;;  %s3016_s7 = inlined_call_operand.vmem [shape: f32[2,1,32], index: 7, kind: input, shape index: {}]   ;;  %s3017_s8 = inlined_call_operand.hbm [shape: f32[2,1,32], index: 8, kind: input, shape index: {}]   ;;  %s3018_s9 = inlined_call_operand.vmem [shape: f32[2,1,32], index: 9, kind: input, shape index: {}]   ;;  %s3019_s10 = inlined_call_operand.hbm [shape: f32[2,8,32], index: 10, kind: output, shape index: {}]  }
   0x1   :  { %3042 = sst [smem:[#allocation37_spill]] %s3009_s0 }
   0x2   :  { %3043 = sst [smem:[#allocation38_spill]] %s3010_s1 }
   0x3   :  { %3044 = sst [smem:[#allocation39_spill]] %s3011_s2 }
   0x4   :  { %3045 = sst [smem:[#allocation40_spill]] %s3012_s3 }
   0x5   :  { %3046 = sst [smem:[#allocation41_spill]] %s3013_s4 }
   0x6   :  { %3047 = sst [smem:[#allocation42_spill]] %s3014_s5 }
   0x7   :  { %3048 = sst [smem:[#allocation43_spill]] %s3016_s7 }
   0x8   :  { %3049 = sst [smem:[#allocation44_spill]] %s3018_s9 }
   0x9   :  { %3050 = sst [smem:[#allocation45_spill]] %s3019_s10 }
   0xa   :  { %15 = vsyncpa [#allocation5], 0 }
   0xb   :  { %17 = vsyncpa [#allocation5 + $0x1], 0 }
   0xc   :  { %18 = vsyncpa [#allocation8], 0 }
   0xd   :  { %20 = vsyncpa [#allocation8 + $0x1], 0 }
   0xe   :  { %21 = vsyncpa [#allocation11], 0 }
   0xf   :  { %23 = vsyncpa [#allocation11 + $0x1], 0 }
  0x10   :  { %24 = vsyncpa [#allocation14], 0 }
  0x11   :  { %26 = vsyncpa [#allocation14 + $0x1], 0 }
  0x12   :  { %27 = vsyncpa [#allocation6], 0 }
  0x13   :  { %29 = vsyncpa [#allocation6 + $0x1], 0  ;;  %s2477_s13 = smov 0   ;;  %s2479_s14 = smov 0  }
  0x14   :  { %s2481_s15 = smov 0   ;;  %s2483_s16 = smov 0  }
  0x15   :  { %s2485_s17 = smov 0   ;;  %s2487_s18 = smov 0  }
  0x16   :  { %s2489_s19 = smov 0   ;;  %s2491_s20 = smov 0  }
  0x17   :  { %s2493_s21 = smov 0   ;;  %s2495_s22 = smov 0  }
  0x18   :  { %s2497_s23 = smov 0  }
  0x19 LB: > { %3051 = sst [smem:[#allocation22_spill]] %s2358_s14  ;;  %s2533_s24 = sadd.s32 4294967295, %s2394_s23   ;;  %s2394_s23 = sphi %s2497_s23, %s35_s23   ;;  %s2390_s22 = sphi %s2495_s22, %s3112_s22   ;;  %s2386_s21 = sphi %s2493_s21, %s3116_s21   ;;  %s2382_s20 = sphi %s2491_s20, %s3110_s20   ;;  %s2378_s19 = sphi %s2489_s19, %s3115_s19   ;;  %s2374_s18 = sphi %s2487_s18, %s3109_s18   ;;  %s2370_s17 = sphi %s2485_s17, %s3114_s17   ;;  %s2366_s16 = sphi %s2483_s16, %s3113_s16   ;;  %s2362_s15 = sphi %s2481_s15, %s3107_s15   ;;  %s2358_s14 = sphi %s2479_s14, %s3106_s14   ;;  %s2354_s13 = sphi %s2477_s13, %s3105_s13  }
  0x1a   : > { %3052 = sst [smem:[#allocation23_spill]] %s2362_s15  ;;  %s1772_s25 = sadd.s32 4294967294, %s2394_s23  }
  0x1b   : > { %3053 = sst [smem:[#allocation24_spill]] %s2366_s16  ;;  %p61_p0 = scmp.ne.s32.totalorder %s2374_s18, %s2370_s17 }
  0x1c   : > { %3054 = sst [smem:[#allocation25_spill]] %s2374_s18  ;;  %p62_p1 = scmp.eq.s32.totalorder %s2394_s23, 0 }
  0x1d   : > { %3055 = sst [smem:[#allocation26_spill]] %s2378_s19  ;;  %p67_p2 = scmp.ne.s32.totalorder %s2370_s17, %s2366_s16 }
  0x1e   : > { %3056 = sst [smem:[#allocation27_spill]] %s2382_s20  ;;  %p68_p3 = scmp.eq.s32.totalorder %s2533_s24, 0 }
  0x1f   : > { %3057 = sst [smem:[#allocation28_spill]] %s2390_s22  ;;  %p63_p4 = por %p62_p1, %p61_p0 }
  0x20   : > { %3058 = sst [smem:[#allocation29_spill]] %s2394_s23  ;;  %p325_p5 = scmp.eq.s32.totalorder %s2533_s24, 3 }
  0x21   : > { %p2549_p6 = por %p68_p3, %p67_p2  ;;  %p331_p7 = scmp.eq.s32.totalorder %s1772_s25, 3 }
  0x22   : > { %p2553_p8 = por %p325_p5, %p61_p0  ;;  %p3025_p10 = scmp.lt.s32.totalorder %s2394_s23, 4 }
  0x23   : > { %p2557_p9 = por %p331_p7, %p67_p2  ;;  %s2563_s11 = sand.u32 1, %s2374_s18  }
  0x24   : > { %s3060_s29 = scalar_select %p2553_p8, 1, 0 }
  0x25   : > { %s3062_s30 = scalar_select %p2557_p9, 1, 0 }
  0x26   : > { %3061 = sst [smem:[#allocation30_spill]] %s3060_s29  ;;  %p2568_p11 = pnand %p3025_p10, %p63_p4 }
  0x27   : > { %3063 = sst [smem:[#allocation31_spill]] %s3062_s30  ;;  %s1777_s25 = sshll.u32 %s2563_s11, 4 }
  0x28   : > { %s1838_s26 = sshll.u32 %s2390_s22, 4  ;;  %s3065_s1 = sld [smem:[#allocation38_spill]] }
  0x29   : > { %s374_s29 = scalar_lea.vmem [#allocation7], %s1777_s25  ;;  %p1789_p12 = scmp.ge.s32.totalorder %s2394_s23, 1 }
  0x2a   : > { %s382_s12 = sshll.u32 %s374_s29, 4  ;;  %s3066_s9 = sand.u32 1, %s2394_s23   ;;  %s383_s12 = int_to_ptr.vmem [resolvable:$true] %s382_s12 }
  0x2b   : > { %s2580_s7 = scalar_lea.sflag [#allocation8], %s3066_s9  ;;  %s3026_s10 = smov 128  }
  0x2c   : > { %s3028_s16 = smov 8   ;;  %p497_p13 = scmp.lt.s32.totalorder %s2394_s23, 5 }
  0x2d   : > { %s44_s29 = sadd.s32 1, %s2386_s21  ;;  %p113_p4 = scmp.ne.s32.totalorder %s2362_s15, %s2358_s14 }
  0x2e   : > { %s379_s30 = scalar_lea.hbm %s3065_s1, %s1838_s26  ;;  %p2589_p0 = pnand %p1789_p12, %p497_p13 }
  0x2f   : > { %s380_s20 = sshll.u32 %s379_s30, 4  ;;  %s106_s30 = sadd.s32 1, %s2362_s15  ;;  %s381_s20 = int_to_ptr.hbm [resolvable:$true] %s380_s20 }
  0x30   : > { %1862 = dma.hbm_to_vmem [thread:$0]  (!%p2568_p11), %s381_s20, 256, %s383_s12, %s2580_s7, %s3026_s10, %s3026_s10, %s3028_s16  }
  0x31   : > { %p45_p2 = scmp.ge.s32.totalorder %s44_s29, 2  ;;  %p119_p5 = scmp.ne.s32.totalorder %s2358_s14, %s2354_s13 }
  0x32   : > { %s2600_s9 = sand.u32 1, %s2362_s15   ;;  %s3069_s20 = sadd.s32 1, %s2390_s22 }
  0x33   : > { %s3118_s29 = smov (%p45_p2, %s44_s29), 0  ;;  %s3120_s20 = smov (!%p45_p2, %s3069_s20), %s2390_s22 }
  0x34   : > { %3068 = sst [smem:[#allocation32_spill]] %s3118_s29  ;;  %s103_s12 = ssub.s32 %s2386_s21, %s3118_s29 }
  0x35   : > { %p115_p7 = por %p113_p4, %p62_p1  ;;  %p49_p12 = scmp.ge.s32.totalorder %s3120_s20, 2 }
  0x36   : > { %p104_p13 = scmp.eq.s32.totalorder %s103_s12, 0  ;;  %p2613_p10 = por %p119_p5, %p68_p3 }
  0x37   : > { %s2618_s13 = sshll.u32 %s2600_s9, 5  ;;  %s3122_s20 = smov (%p49_p12, %s3120_s20), 0 }
  0x38   : > { %s3070_s25 = scalar_select %p2613_p10, 1, 0 }
  0x39   : > { %3072 = sst [smem:[#allocation34_spill]] %s3122_s20  ;;  %s51_s16 = ssub.s32 %s2390_s22, %s3122_s20 }
  0x3a   : > { %3071 = sst [smem:[#allocation33_spill]] %s3070_s25  ;;  %s2628_s1 = sshll.u32 %s2386_s21, 5 }
  0x3b   : > { %s2623_s10 = scalar_select %p104_p13, %s2362_s15, %s106_s30  }
  0x3c   : > { %p52_p1 = scmp.eq.s32.totalorder %s51_s16, 0  ;;  %p3074_p2 = scmp.lt.s32.totalorder %s2394_s23, 4 }
  0x3d   : > { %3073 = sst [smem:[#allocation35_spill]] %s2623_s10  ;;  %s3076_s29 = sadd.s32 1, %s2374_s18 }
  0x3e   : > { %p2632_p3 = pnand %p3074_p2, %p115_p7  ;;  %s3078_s4 = sld [smem:[#allocation41_spill]] }
  0x3f   : > { %s2639_s5 = scalar_select %p52_p1, %s2374_s18, %s3076_s29  }
  0x40   : > { %s424_s20 = scalar_lea.vmem [#allocation10], %s2618_s13  ;;  %s3079_s16 = sand.u32 1, %s2394_s23  }
  0x41   : > { %3077 = sst [smem:[#allocation36_spill]] %s2639_s5  ;;  %s432_s10 = sshll.u32 %s424_s20, 4  ;;  %s433_s10 = int_to_ptr.vmem [resolvable:$true] %s432_s10 }
  0x42   : > { %s2648_s15 = scalar_lea.sflag [#allocation11], %s3079_s16  ;;  %s3080_s14 = smov 8  }
  0x43   : > { %s3081_s29 = smov 128   ;;  %s1775_s3 = sshll.u32 %s2563_s11, 3 }
  0x44   : > { %s429_s25 = scalar_lea.hbm %s3078_s4, %s2628_s1  ;;  %s1776_s19 = sshll.u32 %s2390_s22, 3 }
  0x45   : > { %s430_s30 = sshll.u32 %s429_s25, 4  ;;  %s3082_s0 = sld [smem:[#allocation37_spill]]  ;;  %s431_s30 = int_to_ptr.hbm [resolvable:$true] %s430_s30 }
  0x46   : > { %1868 = dma.hbm_to_vmem [thread:$0]  (!%p2632_p3), %s431_s30, 512, %s433_s10, %s2648_s15, %s3081_s29, %s3081_s29, %s3080_s14  }
  0x47   : > { %s355_s5 = scalar_lea.vmem [#allocation4], %s1775_s3  ;;  %s352_s23 = scalar_lea.sflag [#allocation5], %s2563_s11 }
  0x48   : > { %s363_s18 = sshll.u32 %s355_s5, 4  ;;  %s3083_s2 = sld [smem:[#allocation39_spill]]  ;;  %s364_s18 = int_to_ptr.vmem [resolvable:$true] %s363_s18 }
  0x49   : > { %s396_s4 = scalar_lea.vmem [#allocation9], %s2618_s13 }
  0x4a   : > { %s404_s25 = sshll.u32 %s396_s4, 4  ;;  %s405_s25 = int_to_ptr.vmem [resolvable:$true] %s404_s25 }
  0x4b   : > { %s359_s20 = scalar_lea.hbm %s3082_s0, %s1776_s19 }
  0x4c   : > { %s361_s16 = sshll.u32 %s359_s20, 4  ;;  %s362_s16 = int_to_ptr.hbm [resolvable:$true] %s361_s16 }
  0x4d   : > { %1859 = dma.hbm_to_vmem [thread:$0]  (!%p2568_p11), %s362_s16, 128, %s364_s18, %s352_s23  }
  0x4e   : > { %s401_s22 = scalar_lea.hbm %s3083_s2, %s2628_s1  ;;  %s457_s18 = scalar_lea.hbm %s3015_s6, %s2628_s1 }
  0x4f   : > { %s402_s19 = sshll.u32 %s401_s22, 4  ;;  %s452_s23 = scalar_lea.vmem [#allocation12], %s2618_s13  ;;  %s403_s19 = int_to_ptr.hbm [resolvable:$true] %s402_s19 }
  0x50   : > { %1865 = dma.hbm_to_vmem [thread:$0]  (!%p2632_p3), %s403_s19, 512, %s405_s25, %s2580_s7, %s3081_s29, %s3081_s29, %s3080_s14  }
  0x51   : > { %s460_s11 = sshll.u32 %s452_s23, 4  ;;  %s458_s3 = sshll.u32 %s457_s18, 4  ;;  %s461_s11 = int_to_ptr.vmem [resolvable:$true] %s460_s11  ;;  %s459_s3 = int_to_ptr.hbm [resolvable:$true] %s458_s3 }
  0x52   : > { %1871 = dma.hbm_to_vmem [thread:$0]  (!%p2632_p3), %s459_s3, 512, %s461_s11, %s2648_s15, %s3081_s29, %s3081_s29, %s3080_s14  }
  0x53   : > { %s482_s16 = scalar_lea.hbm %s3017_s8, %s2386_s21  ;;  %s479_s7 = scalar_lea.vmem [#allocation13], %s2600_s9 }
  0x54   : > { %s484_s10 = sshll.u32 %s482_s16, 4  ;;  %s486_s30 = sshll.u32 %s479_s7, 4  ;;  %s485_s10 = int_to_ptr.hbm [resolvable:$true] %s484_s10  ;;  %s487_s30 = int_to_ptr.vmem [resolvable:$true] %s486_s30 }
  0x55   : > { %s477_s1 = scalar_lea.sflag [#allocation14], %s2600_s9  ;;  %501 = sbr.rel (%p2589_p0) target bundleno = 2088 (0x828), region = 60 }
  0x56   : > { %1874 = dma.hbm_to_vmem [thread:$0]  (!%p2632_p3), %s485_s10, 16, %s487_s30, %s477_s1  }
  0x57   : > { %s2697_s13 = sand.u32 (!%p2589_p0), 1, %s2370_s17  }
  0x58   : > { %s3041_s14 = sshll.u32 (!%p2589_p0), %s2697_s13, 3  ;;  %s504_s15 = scalar_lea.sflag (!%p2589_p0), [#allocation5], %s2697_s13 }
  0x59   : > { %s2703_s29 = scalar_lea.vmem (!%p2589_p0), [#allocation4], %s3041_s14 }
  0x5a   : > { %2329 = dma.done.wait (%p2549_p6), %s504_s15, 128  }
  0x5b   : > { %2331 = vsyncadd (%p2549_p6), %s504_s15, 4294967168  ;;  %s513_s26 = sand.u32 1, %s2533_s24   ;;  %s1791_s9 = sshll.u32 %s2697_s13, 4 }
  0x5c   : > { %s514_s12 = scalar_lea.sflag [#allocation8], %s513_s26  ;;  %s2711_s4 = scalar_lea.vmem [#allocation7], %s1791_s9 }
  0x5d   : > { %2333 = dma.done.wait (%p2549_p6), %s514_s12, 256  }
  0x5e   : > { %2335 = vsyncadd (%p2549_p6), %s514_s12, 4294967040  ;;  %s3084_s25 = sld [smem:[#allocation22_spill]] }
  0x64   : > { %s2718_s5 = sand.u32 1, %s3084_s25  }
  0x65   : > { %s1792_s27 = sshll.u32 %s2718_s5, 5 }
  0x66   : > { %s2721_s18 = scalar_lea.vmem [#allocation9], %s1792_s27 }
  0x67   : > { %2337 = dma.done.wait (%p2613_p10), %s514_s12, 512  }
  0x68   : > { %2339 = vsyncadd (%p2613_p10), %s514_s12, 4294966784  ;;  %s534_s24 = scalar_lea.sflag [#allocation11], %s513_s26  ;;  %s537_s23 = scalar_lea.vmem [#allocation10], %s1792_s27 }
  0x69   : > { %2341 = dma.done.wait (%p2613_p10), %s534_s24, 1024  }
  0x6a   : > { %2343 = vsyncadd (%p2613_p10), %s534_s24, 4294966272  ;;  %s2731_s28 = scalar_lea.vmem [#allocation12], %s1792_s27  ;;  %s554_s11 = scalar_lea.sflag [#allocation14], %s2718_s5 }
  0x6b   : > { %2345 = dma.done.wait (%p2613_p10), %s554_s11, 16  }
  0x6c   : > { %2347 = vsyncadd (%p2613_p10), %s554_s11, 4294967280  ;;  %s3086_s22 = sld [smem:[#allocation26_spill]]  ;;  %s3091_s0 = sshll.u32 %s2697_s13, 3 }
  0x6d   : > { %s3087_s7 = sld [smem:[#allocation40_spill]]  ;;  %s2761_s2 = scalar_lea.vmem [#allocation15], %s3091_s0 }
  0x6e   : > { %s3088_s26 = sld [smem:[#allocation42_spill]] }
  0x6f   : > { %s3089_s19 = sld [smem:[#allocation43_spill]] }
  0x70   : > { %s3090_s3 = sld [smem:[#allocation44_spill]] }
  0x72   : > { %p630_p6 = scmp.lt.s32.totalorder %s3086_s22, 1  ;;  %p1796_p10 = scmp.ne.s32.totalorder %s3086_s22, 0 }
  0x74   : > { %s2741_s20 = scalar_select %p630_p6, %s3086_s22, 1 }
  0x75   : > { %645 = sbr.rel (%p1796_p10) target bundleno = 124 (0x7c), region = 88 }
  0x76   : > { %s632_s30 = scalar_lea.vmem %s3087_s7, %s2741_s20  ;;  %s635_s9 = scalar_lea.vmem %s3088_s26, %s2741_s20 }
  0x77   : > { %s638_s27 = scalar_lea.vmem %s3089_s19, %s2741_s20  ;;  %s641_s14 = scalar_lea.vmem %s3090_s3, %s2741_s20 }
  0x7a   : > { %v646_v0 = vld [vmem:[%s2703_s29] sm:$0xff]  ;;  %vm647_vm0 = vcmask 261120  }
  0x7b   : > { %648 = vst.msk [vmem:[#allocation2] sm:$0xff] %vm647_vm0, %v646_v0 }
  0x7c PF: > { %v688_v1 = vld [vmem:[%s537_s23 + $0x18] sm:$0xff]  ;;  %v687_v2 = vld [vmem:[%s537_s23 + $0x10] sm:$0xff]  ;;  %v686_v4 = vld [vmem:[%s537_s23 + $0x8] sm:$0xff]  ;;  %vm660_vm1 = vcmask 261120   ;;  %vm726_vm2 = vcmask 31744   ;;  %vm756_vm3 = vcmask 130048  }
  0x7d   : > { %707 = vmatpush.msra.mxu1 %v688_v1  ;;  %v655_v3 = vld [vmem:[%s2721_s18 + $0x18] sm:$0xff]  ;;  %v654_v5 = vld [vmem:[%s2721_s18 + $0x10] sm:$0xff]  ;;  %v685_v6 = vld [vmem:[%s537_s23] sm:$0xff]  ;;  %s2399_s16 = smov 32   ;;  %s2400_s10 = smov 116   ;;  %vm902_vm0 = vcmask 64544  }
  0x7e   : > { %676 = vmatpush.msra.mxu0 %v655_v3  ;;  %v653_v7 = vld [vmem:[%s2721_s18 + $0x8] sm:$0xff]  ;;  %v650_v8 = vld [vmem:[%s2711_s4] sm:$0xff]  ;;  %s2401_s7 = smov 104   ;;  %s2403_s1 = smov 96  }
  0x7f   : > { %708 = vmatpush.msra.mxu1 %v687_v2  ;;  %v652_v9 = vld [vmem:[%s2721_s18] sm:$0xff]  ;;  %v651_v11 = vld [vmem:[%s2711_s4 + $0x8] sm:$0xff]  ;;  %s2398_s18 = smov 124   ;;  %s2404_s15 = smov 120  }
  0x80   : > { %677 = vmatpush.msra.mxu0 %v654_v5  ;;  %v2035_v13 = vld [vmem:[%s632_s30] ss:$0 sm:$0xff]  ;;  %s2402_s30 = smov 108   ;;  %s2405_s26 = smov 112  }
  0x81   : > { %709 = vmatpush.msra.mxu1 %v686_v4  ;;  %v2036_v20 = vld [vmem:[%s635_s9] ss:$0 sm:$0xff]  ;;  %s2406_s9 = smov 92   ;;  %s2407_s12 = smov 100  }
  0x82   : > { %678 = vmatpush.msra.mxu0 %v653_v7  ;;  %v2770_v10 = vld [vmem:[#allocation2] sm:$0xff]  ;;  %s2408_s25 = smov 84   ;;  %s2409_s19 = smov 88  }
  0x83   : > { %710 = vmatpush.msra.mxu1 %v685_v6  ;;  %s2410_s24 = smov 72   ;;  %s2411_s11 = smov 4  }
  0x84   : > { %1798 = vmatmul.msk.f32.vlgmr.msra.gmra.mxu1 %vm660_vm1, %v650_v8  ;;  %679 = vmatpush.msra.mxu0 %v652_v9  ;;  %s2412_s0 = smov 76   ;;  %s2413_s29 = smov 68  }
  0x85   : > { %1797 = vmatmul.msk.f32.vlgmr.msra.gmra.mxu0 %vm660_vm1, %v2770_v10  ;;  %s2414_s23 = smov 80   ;;  %s2416_s4 = smov 12  }
  0x86   : > { %s2417_s3 = smov 20   ;;  %s2418_s22 = smov 16  }
  0x8c   : > { %1799 = vmatmul.msk.f32.gmra.mxu1 %vm660_vm1, %v651_v11 }
 0x101   : > { %v2777_v12 = vpop.f32.mrf.mxu1 }
 0x102   : > { %v681_v14 = vpop.f32.mrf.mxu0 }
 0x103   : > { %v682_v16 = vadd.f32 %v2035_v13, %v681_v14 }
 0x105   : > { %v2789_v17 = vmul.f32 0.5, %v682_v16 }
 0x109   : > { %v2784_v15 = vpop.f32.mrf.mxu1 }
 0x10a   : > { %817 = vrot.lane.b32.xlu2 %v2784_v15, %s2398_s18  ;;  %1800 = vmatpush.xpose.msk.msra.mxu2 %vm726_vm2, %v2784_v15 }
 0x10e   : > { %1801 = vmatpush.xpose.msk.msra.mxu2 %vm726_vm2, %v2777_v12 }
 0x111   : > { %1802 = vmatmul.msk.f32.vlgmr.msra.gmra.mxu2 %vm726_vm2, %v2789_v17 }
 0x112   : > { %815 = vrot.lane.b32.xlu2 %v2777_v12, %s2398_s18 }
 0x11a   : > { %813 = vrot.lane.b32.xlu2 %v2789_v17, %s2398_s18  ;;  %s2415_s18 = smov 8  }
 0x164   : > { %v818_v35 = vpop.permute.xlu2 %817 }
 0x16c   : > { %v816_v44 = vpop.permute.xlu2 %815 }
 0x174   : > { %v814_v48 = vpop.permute.xlu2 %813 }
 0x194   : > { %v753_v18 = vpop.f32.mrf.mxu2 }
 0x195   : > { %v757_v19 = vsel %vm756_vm3, %v753_v18, -inf }
 0x196   : > { %758 = vmax.xlane.f32.xlu0 %v757_v19 }
 0x1aa   : > { %721 = vrot.lane.b32.xlu0 %v2036_v20, %s2399_s16  ;;  %s2419_s16 = smov 24  }
 0x1b2   : > { %999 = vrot.lane.b32.xlu0 %v2784_v15, %s2400_s10 }
 0x1ba   : > { %1270 = vrot.lane.b32.xlu0 %v2777_v12, %s2401_s7 }
 0x1c2   : > { %1179 = vrot.lane.b32.xlu0 %v2777_v12, %s2402_s30 }
 0x209   : > { %v759_v21 = vpop.xlane.xlu0 %758 }
 0x20a   : > { %v760_v22 = vsub.f32 %v753_v18, %v759_v21 }
 0x20c   : > { %v761_v23 = vmul.f32 1.442695, %v760_v22 }
 0x20e   : > { %2040 = vpow2.f32 %v761_v23 }
 0x214   : > { %v2041_v24 = vpop.eup %2040 }
 0x215   : > { %v763_v25 = vsel %vm756_vm3, %v2041_v24, 0.0 }
 0x216   : > { %764 = vadd.xlane.f32.xlu1 %v763_v25 }
 0x21c   : > { %v722_v26 = vpop.permute.xlu0 %721 }
 0x21d   : > { %v724_v27 = vadd.f32 %v722_v26, %v2777_v12  ;;  %v725_v28 = vadd.f32 %v722_v26, %v2784_v15 }
 0x21f   : > { %v2811_v29 = vpack.i.bf16 %v724_v27, %v725_v28 }
 0x224   : > { %v1000_v55 = vpop.permute.xlu0 %999 }
 0x22c   : > { %v1271_v6 = vpop.permute.xlu0 %1270 }
 0x22f   : > { %1996 = vrot.lane.b32.xlu1 %v2811_v29, %s2403_s1 }
 0x234   : > { %v1180_v9 = vpop.permute.xlu0 %1179 }
 0x237   : > { %908 = vrot.lane.b32.xlu1 %v2784_v15, %s2404_s15 }
 0x23f   : > { %906 = vrot.lane.b32.xlu1 %v2777_v12, %s2404_s15 }
 0x247   : > { %904 = vrot.lane.b32.xlu1 %v2789_v17, %s2404_s15 }
 0x24f   : > { %1090 = vrot.lane.b32.xlu1 %v2784_v15, %s2405_s26 }
 0x257   : > { %2001 = vrot.lane.b32.xlu1 %v2811_v29, %s2406_s9  ;;  %s3097_s9 = sld [smem:[#allocation26_spill]] }
 0x25d   : > { %p1833_p11 = scmp.ne.s32.totalorder %s3097_s9, 1 }
 0x25f   : > { %1086 = vrot.lane.b32.xlu1 %v2789_v17, %s2405_s26 }
 0x267   : > { %1272 = vrot.lane.b32.xlu1 %v2784_v15, %s2401_s7 }
 0x26f   : > { %997 = vrot.lane.b32.xlu1 %v2777_v12, %s2400_s10 }
 0x277   : > { %1181 = vrot.lane.b32.xlu1 %v2784_v15, %s2402_s30 }
 0x27f   : > { %1177 = vrot.lane.b32.xlu1 %v2789_v17, %s2402_s30 }
 0x287   : > { %1359 = vrot.lane.b32.xlu1 %v2789_v17, %s2407_s12 }
 0x289   : > { %v765_v30 = vpop.xlane.xlu1 %764 }
 0x28a   : > { %2042 = vrcp.f32 %v765_v30  ;;  %v777_v37 = vand.u32 2147483648, %v765_v30  ;;  %vm771_vm5 = vweird.f32 %v765_v30  ;;  %v775_v38 = vand.u32 2147483647, %v765_v30 }
 0x28c   : > { %v778_v40 = vor.u32 1.1754944e-38, %v777_v37  ;;  %vm776_vm7 = vcmp.eq.f32.partialorder %v775_v38, 8.507059e+37 }
 0x290   : > { %v2043_v31 = vpop.eup %2042 }
 0x291   : > { %v767_v32 = vmul.f32 %v2043_v31, %v765_v30  ;;  %vm772_vm4 = vweird.f32 %v2043_v31 }
 0x292   : > { %vm773_vm6 = vmor %vm771_vm5, %vm772_vm4 }
 0x293   : > { %v768_v33 = vsub.f32 1.0, %v767_v32 }
 0x295   : > { %v769_v34 = vmul.f32 %v2043_v31, %v768_v33 }
 0x297   : > { %v770_v36 = vadd.f32 %v2043_v31, %v769_v34 }
 0x299   : > { %v774_v39 = vsel %vm773_vm6, %v2043_v31, %v770_v36 }
 0x29a   : > { %v779_v43 = vsel %vm776_vm7, %v778_v40, %v774_v39 }
 0x29b   : > { %v780_v46 = vmul.f32 %v2041_v24, %v779_v43 }
 0x2a1   : > { %v1997_v41 = vpop.permute.xlu1 %1996 }
 0x2a2   : > { %v1998_v42 = vunpack.i.l.bf16 %v1997_v41  ;;  %v1999_v45 = vunpack.i.h.bf16 %v1997_v41 }
 0x2a4   : > { %806 = vmatpush.msra.mxu3 %v1998_v42 }
 0x2a6   : > { %807 = vmatpush.msra.mxu3 %v1999_v45 }
 0x2a7   : > { %1803 = vmatmul.msk.f32.vlgmr.msra.gmra.mxu3 %vm756_vm3, %v780_v46 }
 0x2a8   : > { %1804 = vmatpush.xpose.msk.msrb.mxu3 %vm726_vm2, %v818_v35 }
 0x2a9   : > { %v909_v47 = vpop.permute.xlu1 %908 }
 0x2aa   : > { %1808 = vmatpush.xpose.msk.msrb.mxu2 %vm726_vm2, %v909_v47 }
 0x2ac   : > { %1805 = vmatpush.xpose.msk.msrb.mxu3 %vm726_vm2, %v816_v44 }
 0x2af   : > { %1806 = vmatmul.msk.f32.vlgmr.msrb.gmra.mxu3 %vm726_vm2, %v814_v48 }
 0x2b1   : > { %v907_v49 = vpop.permute.xlu1 %906 }
 0x2b2   : > { %1809 = vmatpush.xpose.msk.msrb.mxu2 %vm726_vm2, %v907_v49 }
 0x2b9   : > { %v905_v50 = vpop.permute.xlu1 %904 }
 0x2ba   : > { %1810 = vmatmul.msk.f32.vlgmr.msrb.gmra.mxu2 %vm726_vm2, %v905_v50 }
 0x2c1   : > { %v1091_v51 = vpop.permute.xlu1 %1090 }
 0x2c2   : > { %1816 = vmatpush.xpose.msk.msra.mxu2 %vm726_vm2, %v1091_v51 }
 0x2c9   : > { %v2002_v52 = vpop.permute.xlu1 %2001 }
 0x2ca   : > { %v2003_v53 = vunpack.i.l.bf16 %v2002_v52  ;;  %v2004_v54 = vunpack.i.h.bf16 %v2002_v52 }
 0x2cc   : > { %892 = vmatpush.msrb.mxu0 %v2003_v53 }
 0x2ce   : > { %893 = vmatpush.msrb.mxu0 %v2004_v54 }
 0x2d0   : > { %1812 = vmatpush.xpose.msk.msra.mxu0 %vm726_vm2, %v1000_v55 }
 0x2d1   : > { %v1087_v56 = vpop.permute.xlu1 %1086 }
 0x2d9   : > { %v1273_v57 = vpop.permute.xlu1 %1272 }
 0x2e1   : > { %v998_v58 = vpop.permute.xlu1 %997 }
 0x2e2   : > { %1813 = vmatpush.xpose.msk.msra.mxu0 %vm726_vm2, %v998_v58 }
 0x2e9   : > { %v1182_v30 = vpop.permute.xlu1 %1181 }
 0x2f1   : > { %v1178_v36 = vpop.permute.xlu1 %1177 }
 0x2f9   : > { %v1360_v37 = vpop.permute.xlu1 %1359 }
 0x32a   : > { %v809_v59 = vpop.f32.mrf.mxu3 }
 0x32b   : > { %812 = vst.msk [vmem:[#allocation3] sm:$0xff] %vm726_vm2, %v809_v59 }
 0x332   : > { %v842_v60 = vpop.f32.mrf.mxu3 }
 0x333   : > { %v845_v61 = vsel %vm756_vm3, %v842_v60, -inf }
 0x334   : > { %846 = vmax.xlane.f32.xlu2 %v845_v61 }
 0x33d   : > { %v933_v62 = vpop.f32.mrf.mxu2 }
 0x33e   : > { %v936_v63 = vsel %vm756_vm3, %v933_v62, -inf }
 0x34c   : > { %1088 = vrot.lane.b32.xlu2 %v2777_v12, %s2405_s26 }
 0x354   : > { %995 = vrot.lane.b32.xlu2 %v2789_v17, %s2400_s10  ;;  %s2420_s10 = smov 28  }
 0x35c   : > { %1268 = vrot.lane.b32.xlu2 %v2789_v17, %s2401_s7 }
 0x364   : > { %1363 = vrot.lane.b32.xlu2 %v2784_v15, %s2407_s12 }
 0x38d   : > { %937 = vmax.xlane.f32.xlu2 %v936_v63 }
 0x3a7   : > { %v847_v0 = vpop.xlane.xlu2 %846 }
 0x3a8   : > { %v848_v1 = vsub.f32 %v842_v60, %v847_v0 }
 0x3aa   : > { %v849_v2 = vmul.f32 1.442695, %v848_v1 }
 0x3ac   : > { %2044 = vpow2.f32 %v849_v2 }
 0x3af   : > { %v1089_v3 = vpop.permute.xlu2 %1088 }
 0x3b0   : > { %1817 = vmatpush.xpose.msk.msra.mxu2 %vm726_vm2, %v1089_v3 }
 0x3b2   : > { %v2045_v4 = vpop.eup %2044 }
 0x3b3   : > { %1818 = vmatmul.msk.f32.vlgmr.msra.gmra.mxu2 %vm726_vm2, %v1087_v56  ;;  %v851_v5 = vsel %vm756_vm3, %v2045_v4, 0.0 }
 0x3b4   : > { %1824 = vmatpush.xpose.msk.msrb.mxu2 %vm726_vm2, %v1273_v57  ;;  %852 = vadd.xlane.f32.xlu0 %v851_v5 }
 0x3b7   : > { %v996_v7 = vpop.permute.xlu2 %995 }
 0x3b8   : > { %1825 = vmatpush.xpose.msk.msrb.mxu2 %vm726_vm2, %v1271_v6 }
 0x3bf   : > { %v1269_v8 = vpop.permute.xlu2 %1268 }
 0x3c0   : > { %1826 = vmatmul.msk.f32.vlgmr.msrb.gmra.mxu2 %vm726_vm2, %v1269_v8 }
 0x3c7   : > { %v1364_v11 = vpop.permute.xlu2 %1363 }
 0x3c8   : > { %1361 = vrot.lane.b32.xlu0 %v2777_v12, %s2407_s12 }
 0x400   : > { %v938_v14 = vpop.xlane.xlu2 %937 }
 0x401   : > { %v939_v16 = vsub.f32 %v933_v62, %v938_v14 }
 0x403   : > { %v940_v19 = vmul.f32 1.442695, %v939_v16 }
 0x427   : > { %v853_v13 = vpop.xlane.xlu0 %852 }
 0x428   : > { %2046 = vrcp.f32 %v853_v13  ;;  %v865_v20 = vand.u32 2147483648, %v853_v13  ;;  %v863_v22 = vand.u32 2147483647, %v853_v13  ;;  %vm859_vm9 = vweird.f32 %v853_v13 }
 0x429   : > { %2048 = vpow2.f32 %v940_v19 }
 0x42a   : > { %v866_v24 = vor.u32 1.1754944e-38, %v865_v20  ;;  %vm864_vm11 = vcmp.eq.f32.partialorder %v863_v22, 8.507059e+37 }
 0x42e   : > { %v2047_v15 = vpop.eup %2046 }
 0x42f   : > { %v855_v17 = vmul.f32 %v2047_v15, %v853_v13  ;;  %vm860_vm8 = vweird.f32 %v2047_v15  ;;  %v2861_v31 = vpop.eup %2048 }
 0x430   : > { %vm861_vm10 = vmor %vm859_vm9, %vm860_vm8  ;;  %v942_v32 = vsel %vm756_vm3, %v2861_v31, 0.0 }
 0x431   : > { %v856_v18 = vsub.f32 1.0, %v855_v17 }
 0x433   : > { %v857_v21 = vmul.f32 %v2047_v15, %v856_v18 }
 0x435   : > { %v858_v23 = vadd.f32 %v2047_v15, %v857_v21 }
 0x436   : > { %v1115_v12 = vpop.f32.mrf.mxu2 }
 0x437   : > { %v1118_v25 = vsel %vm756_vm3, %v1115_v12, -inf  ;;  %v862_v26 = vsel %vm861_vm10, %v2047_v15, %v858_v23 }
 0x438   : > { %1119 = vmax.xlane.f32.xlu1 %v1118_v25  ;;  %v867_v27 = vsel %vm864_vm11, %v866_v24, %v862_v26 }
 0x439   : > { %v868_v28 = vmul.f32 %v2045_v4, %v867_v27 }
 0x43a   : > { %v1362_v35 = vpop.permute.xlu0 %1361 }
 0x43b   : > { %1807 = vmatmul.msk.f32.vlgmr.msrb.gmra.mxu0 %vm756_vm3, %v868_v28 }
 0x43c   : > { %1820 = vmatpush.xpose.msk.msrb.mxu0 %vm726_vm2, %v1182_v30 }
 0x440   : > { %1821 = vmatpush.xpose.msk.msrb.mxu0 %vm726_vm2, %v1180_v9  ;;  %943 = vadd.xlane.f32.xlu1 %v942_v32 }
 0x443   : > { %1814 = vmatmul.msk.f32.vlgmr.msra.gmra.mxu0 %vm726_vm2, %v996_v7  ;;  %v1297_v33 = vpop.f32.mrf.mxu2 }
 0x444   : > { %1828 = vmatpush.xpose.msk.msra.mxu0 %vm726_vm2, %v1364_v11  ;;  %v1300_v34 = vsel %vm756_vm3, %v1297_v33, -inf }
 0x445   : > { %1301 = vmax.xlane.f32.xlu0 %v1300_v34 }
 0x448   : > { %1829 = vmatpush.xpose.msk.msra.mxu0 %vm726_vm2, %v1362_v35 }
 0x44b   : > { %1822 = vmatmul.msk.f32.vlgmr.msrb.gmra.mxu0 %vm726_vm2, %v1178_v36 }
 0x453   : > { %1830 = vmatmul.msk.f32.vlgmr.msra.gmra.mxu0 %vm726_vm2, %v1360_v37 }
 0x4ab   : > { %v1120_v44 = vpop.xlane.xlu1 %1119 }
 0x4ac   : > { %v1121_v46 = vsub.f32 %v1115_v12, %v1120_v44 }
 0x4ae   : > { %v1122_v50 = vmul.f32 1.442695, %v1121_v46 }
 0x4b3   : > { %v944_v56 = vpop.xlane.xlu1 %943 }
 0x4b4   : > { %v956_v15 = vand.u32 2147483648, %v944_v56  ;;  %vm950_vm13 = vweird.f32 %v944_v56  ;;  %v954_v17 = vand.u32 2147483647, %v944_v56 }
 0x4b6   : > { %v957_v22 = vor.u32 1.1754944e-38, %v956_v15  ;;  %vm955_vm15 = vcmp.eq.f32.partialorder %v954_v17, 8.507059e+37 }
 0x4b8   : > { %v895_v38 = vpop.f32.mrf.mxu0  ;;  %v1302_v39 = vpop.xlane.xlu0 %1301 }
 0x4b9   : > { %v1303_v40 = vsub.f32 %v1297_v33, %v1302_v39 }
 0x4bb   : > { %v1304_v41 = vmul.f32 1.442695, %v1303_v40 }
 0x4bd   : > { %2050 = vpow2.f32 %v1304_v41 }
 0x4be   : > { %2052 = vpow2.f32 %v1122_v50 }
 0x4bf   : > { %2054 = vrcp.f32 %v944_v56 }
 0x4c0   : > { %v1024_v42 = vpop.f32.mrf.mxu0 }
 0x4c1   : > { %v1027_v43 = vsel %vm756_vm3, %v1024_v42, -inf }
 0x4c2   : > { %1028 = vmax.xlane.f32.xlu0 %v1027_v43 }
 0x4c3   : > { %v2874_v45 = vpop.eup %2050 }
 0x4c4   : > { %v1306_v49 = vsel %vm756_vm3, %v2874_v45, 0.0  ;;  %v2880_v53 = vpop.eup %2052 }
 0x4c5   : > { %v1124_v54 = vsel %vm756_vm3, %v2880_v53, 0.0  ;;  %v2055_v61 = vpop.eup %2054 }
 0x4c6   : > { %v946_v1 = vmul.f32 %v2055_v61, %v944_v56  ;;  %vm951_vm12 = vweird.f32 %v2055_v61 }
 0x4c7   : > { %vm952_vm14 = vmor %vm950_vm13, %vm951_vm12 }
 0x4c8   : > { %v1206_v47 = vpop.f32.mrf.mxu0  ;;  %v947_v4 = vsub.f32 1.0, %v946_v1 }
 0x4c9   : > { %v1209_v48 = vsel %vm756_vm3, %v1206_v47, -inf }
 0x4ca   : > { %1210 = vmax.xlane.f32.xlu2 %v1209_v48  ;;  %1307 = vadd.xlane.f32.xlu0 %v1306_v49  ;;  %v948_v9 = vmul.f32 %v2055_v61, %v947_v4 }
 0x4cc   : > { %v949_v13 = vadd.f32 %v2055_v61, %v948_v9 }
 0x4ce   : > { %v953_v20 = vsel %vm952_vm14, %v2055_v61, %v949_v13 }
 0x4cf   : > { %v958_v24 = vsel %vm955_vm15, %v957_v22, %v953_v20 }
 0x4d0   : > { %v1388_v51 = vpop.f32.mrf.mxu0  ;;  %v959_v26 = vmul.f32 %v2861_v31, %v958_v24 }
 0x4d1   : > { %v1391_v52 = vsel %vm756_vm3, %v1388_v51, -inf }
 0x4d2   : > { %1392 = vmax.xlane.f32.xlu2 %v1391_v52 }
 0x4da   : > { %1125 = vadd.xlane.f32.xlu2 %v1124_v54 }
 0x4de   : > { %2011 = vrot.lane.b32.xlu0 %v2811_v29, %s2408_s25 }
 0x4f2   : > { %2006 = vrot.lane.b32.xlu2 %v2811_v29, %s2409_s19 }
 0x4fa   : > { %2026 = vrot.lane.b32.xlu2 %v2811_v29, %s2410_s24 }
 0x502   : > { %899 = vrot.lane.b32.xlu2 %v895_v38, %s2411_s11 }
 0x535   : > { %v1029_v55 = vpop.xlane.xlu0 %1028 }
 0x536   : > { %v1030_v57 = vsub.f32 %v1024_v42, %v1029_v55 }
 0x538   : > { %v1031_v58 = vmul.f32 1.442695, %v1030_v57 }
 0x53a   : > { %2056 = vpow2.f32 %v1031_v58 }
 0x53d   : > { %v1211_v59 = vpop.xlane.xlu2 %1210  ;;  %v2893_v6 = vpop.xlane.xlu0 %1307 }
 0x53e   : > { %v1212_v60 = vsub.f32 %v1206_v47, %v1211_v59 }
 0x540   : > { %v2887_v62 = vpop.eup %2056  ;;  %v1213_v63 = vmul.f32 1.442695, %v1212_v60 }
 0x541   : > { %v1033_v0 = vsel %vm756_vm3, %v2887_v62, 0.0 }
 0x542   : > { %2058 = vpow2.f32 %v1213_v63  ;;  %1034 = vadd.xlane.f32.xlu0 %v1033_v0 }
 0x545   : > { %v1393_v2 = vpop.xlane.xlu2 %1392 }
 0x546   : > { %v1394_v3 = vsub.f32 %v1388_v51, %v1393_v2 }
 0x548   : > { %v2891_v5 = vpop.eup %2058  ;;  %v1395_v7 = vmul.f32 1.442695, %v1394_v3 }
 0x549   : > { %v1215_v8 = vsel %vm756_vm3, %v2891_v5, 0.0 }
 0x54a   : > { %2060 = vpow2.f32 %v1395_v7  ;;  %1216 = vadd.xlane.f32.xlu1 %v1215_v8 }
 0x54d   : > { %v2897_v11 = vpop.xlane.xlu2 %1125 }
 0x54e   : > { %v1138_v22 = vand.u32 2147483648, %v2897_v11 }
 0x550   : > { %v2899_v14 = vpop.eup %2060  ;;  %v2012_v16 = vpop.permute.xlu0 %2011 }
 0x551   : > { %v1397_v18 = vsel %vm756_vm3, %v2899_v14, 0.0  ;;  %v2013_v19 = vunpack.i.l.bf16 %v2012_v16  ;;  %v2014_v21 = vunpack.i.h.bf16 %v2012_v16 }
 0x552   : > { %1398 = vadd.xlane.f32.xlu1 %v1397_v18 }
 0x553   : > { %1074 = vmatpush.msrb.mxu1 %v2013_v19 }
 0x555   : > { %v2007_v23 = vpop.permute.xlu2 %2006  ;;  %1075 = vmatpush.msrb.mxu1 %v2014_v21 }
 0x556   : > { %v2008_v12 = vunpack.i.l.bf16 %v2007_v23  ;;  %2021 = vrot.lane.b32.xlu0 %v2811_v29, %s2412_s0  ;;  %v2009_v25 = vunpack.i.h.bf16 %v2007_v23  ;;  %v1136_v23 = vand.u32 2147483647, %v2897_v11 }
 0x558   : > { %983 = vmatpush.msra.mxu3 %v2008_v12 }
 0x55a   : > { %984 = vmatpush.msra.mxu3 %v2009_v25  ;;  %v1139_v25 = vor.u32 1.1754944e-38, %v1138_v22 }
 0x55b   : > { %1811 = vmatmul.msk.f32.vlgmr.msra.gmra.mxu3 %vm756_vm3, %v959_v26 }
 0x55d   : > { %v2906_v27 = vpop.permute.xlu2 %2026 }
 0x55e   : > { %2031 = vrot.lane.b32.xlu0 %v2811_v29, %s2413_s29 }
 0x565   : > { %v900_v28 = vpop.permute.xlu2 %899 }
 0x566   : > { %903 = vst.msk [vmem:[#allocation3] sm:$0xff] %vm902_vm0, %v900_v28  ;;  %vm1132_vm0 = vweird.f32 %v2897_v11 }
 0x56b   : > { %2016 = vrot.lane.b32.xlu1 %v2811_v29, %s2414_s23 }
 0x5b5   : > { %v1035_v30 = vpop.xlane.xlu0 %1034 }
 0x5b6   : > { %2062 = vrcp.f32 %v1035_v30  ;;  %v1047_v36 = vand.u32 2147483648, %v1035_v30  ;;  %v1045_v37 = vand.u32 2147483647, %v1035_v30  ;;  %vm1041_vm4 = vweird.f32 %v1035_v30 }
 0x5b8   : > { %v1048_v40 = vor.u32 1.1754944e-38, %v1047_v36  ;;  %vm1046_vm6 = vcmp.eq.f32.partialorder %v1045_v37, 8.507059e+37 }
 0x5bc   : > { %v2063_v32 = vpop.eup %2062 }
 0x5bd   : > { %v1037_v33 = vmul.f32 %v2063_v32, %v1035_v30  ;;  %v1217_v34 = vpop.xlane.xlu1 %1216  ;;  %vm1042_vm2 = vweird.f32 %v2063_v32 }
 0x5be   : > { %2064 = vrcp.f32 %v1217_v34  ;;  %vm1043_vm5 = vmor %vm1041_vm4, %vm1042_vm2  ;;  %v1229_v47 = vand.u32 2147483648, %v1217_v34  ;;  %v1227_v51 = vand.u32 2147483647, %v1217_v34  ;;  %vm1223_vm8 = vweird.f32 %v1217_v34 }
 0x5bf   : > { %v1038_v31 = vsub.f32 1.0, %v1037_v33  ;;  %2066 = vrcp.f32 %v2897_v11  ;;  %vm1137_vm4 = vcmp.eq.f32.partialorder %v1136_v23, 8.507059e+37 }
 0x5c0   : > { %v1230_v58 = vor.u32 1.1754944e-38, %v1229_v47  ;;  %vm1228_vm10 = vcmp.eq.f32.partialorder %v1227_v51, 8.507059e+37  ;;  %v1453_v47 = vld [vmem:[%s2731_s28 + $0x10] sm:$0xff] }
 0x5c1   : > { %v1039_v35 = vmul.f32 %v2063_v32, %v1038_v31 }
 0x5c3   : > { %v1040_v38 = vadd.f32 %v2063_v32, %v1039_v35  ;;  %v2028_v35 = vunpack.i.l.bf16 %v2906_v27 }
 0x5c4   : > { %v2065_v39 = vpop.eup %2064 }
 0x5c5   : > { %v1219_v41 = vmul.f32 %v2065_v39, %v1217_v34  ;;  %v1399_v29 = vpop.xlane.xlu1 %1398  ;;  %v1044_v42 = vsel %vm1043_vm5, %v2063_v32, %v1040_v38  ;;  %v2067_v46 = vpop.eup %2066  ;;  %vm1224_vm7 = vweird.f32 %v2065_v39  ;;  %v2029_v38 = vunpack.i.h.bf16 %v2906_v27 }
 0x5c6   : > { %2068 = vrcp.f32 %v1399_v29  ;;  %v1049_v44 = vsel %vm1046_vm6, %v1048_v40, %v1044_v42  ;;  %v1128_v54 = vmul.f32 %v2067_v46, %v2897_v11  ;;  %vm1225_vm9 = vmor %vm1223_vm8, %vm1224_vm7  ;;  %v1411_v2 = vand.u32 2147483648, %v1399_v29 }
 0x5c7   : > { %v1220_v43 = vsub.f32 1.0, %v1219_v41  ;;  %2070 = vrcp.f32 %v2893_v6  ;;  %v1050_v49 = vmul.f32 %v2887_v62, %v1049_v44  ;;  %v1409_v7 = vand.u32 2147483647, %v1399_v29 }
 0x5c8   : > { %v2022_v48 = vpop.permute.xlu0 %2021  ;;  %v1129_v63 = vsub.f32 1.0, %v1128_v54  ;;  %vm1405_vm12 = vweird.f32 %v1399_v29  ;;  %v1412_v17 = vor.u32 1.1754944e-38, %v1411_v2  ;;  %vm1133_vm15 = vweird.f32 %v2067_v46  ;;  %v2037_v54 = vld [vmem:[%s638_s27] ss:$0 sm:$0xff] }
 0x5c9   : > { %v1221_v50 = vmul.f32 %v2065_v39, %v1220_v43  ;;  %v2023_v52 = vunpack.i.l.bf16 %v2022_v48  ;;  %1815 = vmatmul.msk.f32.vlgmr.msrb.gmra.mxu1 %vm756_vm3, %v1050_v49  ;;  %v2024_v56 = vunpack.i.h.bf16 %v2022_v48  ;;  %vm1410_vm14 = vcmp.eq.f32.partialorder %v1409_v7, 8.507059e+37  ;;  %vm1134_vm2 = vmor %vm1132_vm0, %vm1133_vm15  ;;  %v1452_v48 = vld [vmem:[%s2731_s28 + $0x8] sm:$0xff]  ;;  %v1451_v49 = vld [vmem:[%s2731_s28] sm:$0xff] }
 0x5ca   : > { %v1130_v13 = vmul.f32 %v2067_v46, %v1129_v63  ;;  %vm1314_vm6 = vweird.f32 %v2893_v6  ;;  %v1318_v11 = vand.u32 2147483647, %v2893_v6 }
 0x5cb   : > { %v1222_v55 = vadd.f32 %v2065_v39, %v1221_v50  ;;  %1256 = vmatpush.msra.mxu1 %v2023_v52 }
 0x5cc   : > { %v2069_v57 = vpop.eup %2068  ;;  %v1131_v20 = vadd.f32 %v2067_v46, %v1130_v13  ;;  %vm1319_vm8 = vcmp.eq.f32.partialorder %v1318_v11, 8.507059e+37 }
 0x5cd   : > { %v1226_v59 = vsel %vm1225_vm9, %v2065_v39, %v1222_v55  ;;  %v1401_v60 = vmul.f32 %v2069_v57, %v1399_v29  ;;  %1257 = vmatpush.msra.mxu1 %v2024_v56  ;;  %v2071_v61 = vpop.eup %2070  ;;  %vm1406_vm11 = vweird.f32 %v2069_v57  ;;  %vm993_vm9 = vcmask 97344  }
 0x5ce   : > { %v1231_v62 = vsel %vm1228_vm10, %v1230_v58, %v1226_v59  ;;  %v1310_v9 = vmul.f32 %v2071_v61, %v2893_v6  ;;  %vm1407_vm13 = vmor %vm1405_vm12, %vm1406_vm11  ;;  %v1135_v12 = vsel %vm1134_vm2, %v2067_v46, %v1131_v20  ;;  %vm1315_vm5 = vweird.f32 %v2071_v61  ;;  %v1454_v46 = vld [vmem:[%s2731_s28 + $0x18] sm:$0xff]  ;;  %s3095_s28 = scalar_lea.vmem [#allocation13], %s2718_s5 }
 0x5cf   : > { %v1402_v0 = vsub.f32 1.0, %v1401_v60  ;;  %v1232_v1 = vmul.f32 %v2891_v5, %v1231_v62  ;;  %v1140_v28 = vsel %vm1137_vm4, %v1139_v25, %v1135_v12  ;;  %vm1316_vm7 = vmor %vm1314_vm6, %vm1315_vm5  ;;  %vm1175_vm10 = vcmask 162944   ;;  %1474 = vmatpush.msra.mxu2 %v1454_v46  ;;  %v2038_v23 = vld [vmem:[%s3095_s28] ss:$0 sm:$0xff] }
 0x5d0   : > { %v2032_v3 = vpop.permute.xlu0 %2031  ;;  %v1311_v19 = vsub.f32 1.0, %v1310_v9  ;;  %v1141_v31 = vmul.f32 %v2880_v53, %v1140_v28  ;;  %vm1266_vm11 = vcmask 195744   ;;  %vm1357_vm12 = vcmask 228544   ;;  %v2039_v12 = vld [vmem:[%s641_s14] ss:$0 sm:$0xff] }
 0x5d1   : > { %v1403_v4 = vmul.f32 %v2069_v57, %v1402_v0  ;;  %v2033_v8 = vunpack.i.l.bf16 %v2032_v3  ;;  %1823 = vmatmul.msk.f32.vlgmr.msra.gmra.mxu1 %vm756_vm3, %v1232_v1  ;;  %v2034_v16 = vunpack.i.h.bf16 %v2032_v3  ;;  %1475 = vmatpush.msra.mxu2 %v1453_v47 }
 0x5d2   : > { %v1312_v24 = vmul.f32 %v2071_v61, %v1311_v19 }
 0x5d3   : > { %v1404_v15 = vadd.f32 %v2069_v57, %v1403_v4  ;;  %1438 = vmatpush.msrb.mxu1 %v2033_v8  ;;  %1476 = vmatpush.msra.mxu2 %v1452_v48 }
 0x5d4   : > { %v1313_v33 = vadd.f32 %v2071_v61, %v1312_v24 }
 0x5d5   : > { %v1408_v18 = vsel %vm1407_vm13, %v2069_v57, %v1404_v15  ;;  %1439 = vmatpush.msrb.mxu1 %v2034_v16  ;;  %1477 = vmatpush.msra.mxu2 %v1451_v49  ;;  %vm1448_vm13 = vcmask 261344  }
 0x5d6   : > { %v1413_v5 = vsel %vm1410_vm14, %v1412_v17, %v1408_v18  ;;  %v1317_v36 = vsel %vm1316_vm7, %v2071_v61, %v1313_v33  ;;  %v2421_v61 = vmov 32.0  }
 0x5d7   : > { %v1414_v21 = vmul.f32 %v2899_v14, %v1413_v5  ;;  %v1320_v14 = vand.u32 2147483648, %v2893_v6  ;;  %2072 = vrcp.f32 %v2421_v61 }
 0x5d9   : > { %1831 = vmatmul.msk.f32.vlgmr.msrb.gmra.mxu1 %vm756_vm3, %v1414_v21  ;;  %v1321_v37 = vor.u32 1.1754944e-38, %v1320_v14 }
 0x5db   : > { %v1322_v39 = vsel %vm1319_vm8, %v1321_v37, %v1317_v36 }
 0x5dc   : > { %v1323_v40 = vmul.f32 %v2874_v45, %v1322_v39 }
 0x5dd   : > { %v2017_v26 = vpop.permute.xlu1 %2016  ;;  %v2073_v62 = vpop.eup %2072 }
 0x5de   : > { %v2018_v30 = vunpack.i.l.bf16 %v2017_v26  ;;  %v986_v32 = vpop.f32.mrf.mxu3  ;;  %v2019_v34 = vunpack.i.h.bf16 %v2017_v26  ;;  %v1488_v63 = vmul.f32 32.0, %v2073_v62  ;;  %vm1492_vm14 = vweird.f32 %v2073_v62 }
 0x5df   : > { %990 = vrot.lane.b32.xlu1 %v986_v32, %s2415_s18 }
 0x5e0   : > { %1165 = vmatpush.msrb.mxu3 %v2018_v30  ;;  %v1489_v0 = vsub.f32 1.0, %v1488_v63 }
 0x5e2   : > { %1166 = vmatpush.msrb.mxu3 %v2019_v34  ;;  %v1490_v1 = vmul.f32 %v2073_v62, %v1489_v0 }
 0x5e3   : > { %1819 = vmatmul.msk.f32.vlgmr.msrb.gmra.mxu3 %vm756_vm3, %v1141_v31 }
 0x5e4   : > { %1347 = vmatpush.msra.mxu3 %v2028_v35  ;;  %v1491_v2 = vadd.f32 %v2073_v62, %v1490_v1 }
 0x5e6   : > { %1348 = vmatpush.msra.mxu3 %v2029_v38  ;;  %v1493_v3 = vsel %vm1492_vm14, %v2073_v62, %v1491_v2 }
 0x5eb   : > { %1827 = vmatmul.msk.f32.vlgmr.msra.gmra.mxu3 %vm756_vm3, %v1323_v40  ;;  %vm1084_vm3 = vcmask 130144  }
 0x646   : > { %v1077_v6 = vpop.f32.mrf.mxu1 }
 0x647   : > { %1081 = vrot.lane.b32.xlu0 %v1077_v6, %s2416_s4 }
 0x64e   : > { %v1259_v53 = vpop.f32.mrf.mxu1 }
 0x64f   : > { %1263 = vrot.lane.b32.xlu1 %v1259_v53, %s2417_s3 }
 0x651   : > { %v991_v41 = vpop.permute.xlu1 %990 }
 0x652   : > { %994 = vst.msk [vmem:[#allocation3] sm:$0xff] %vm993_vm9, %v991_v41 }
 0x656   : > { %v1441_v27 = vpop.f32.mrf.mxu1 }
 0x666   : > { %v1168_v29 = vpop.f32.mrf.mxu3 }
 0x667   : > { %1172 = vrot.lane.b32.xlu2 %v1168_v29, %s2418_s22 }
 0x66e   : > { %v1350_v42 = vpop.f32.mrf.mxu3 }
 0x66f   : > { %1354 = vrot.lane.b32.xlu0 %v1350_v42, %s2419_s16  ;;  %1445 = vrot.lane.b32.xlu2 %v1441_v27, %s2420_s10 }
 0x6b9   : > { %v1082_v45 = vpop.permute.xlu0 %1081 }
 0x6ba   : > { %1085 = vst.msk [vmem:[#allocation3] sm:$0xff] %vm1084_vm3, %v1082_v45 }
 0x6c1   : > { %v1173_v43 = vpop.permute.xlu2 %1172  ;;  %v1264_v44 = vpop.permute.xlu1 %1263 }
 0x6c2   : > { %1176 = vst.msk [vmem:[#allocation3] sm:$0xff] %vm1175_vm10, %v1173_v43 }
 0x6c3   : > { %1267 = vst.msk [vmem:[#allocation3] sm:$0xff] %vm1266_vm11, %v1264_v44 }
 0x6c9   : > { %v1446_v51 = vpop.permute.xlu2 %1445 }
 0x6e1   : > { %v1355_v50 = vpop.permute.xlu0 %1354 }
 0x6e2   : > { %1358 = vst.msk [vmem:[#allocation3] sm:$0xff] %vm1357_vm12, %v1355_v50 }
 0x6e3   : > { %1449 = vst.msk [vmem:[#allocation3] sm:$0xff] %vm1448_vm13, %v1446_v51 }
 0x6ea   : > { %v1450_v52 = vld [vmem:[#allocation3] sm:$0xff] }
 0x6eb   : > { %1832 = vmatmul.msk.f32.vlgmr.msra.gmra.mxu2 %vm660_vm1, %v1450_v52 }
 0x76e   : > { %v1479_v55 = vpop.f32.mrf.mxu2 }
 0x76f   : > { %v1480_v56 = vadd.f32 %v2037_v54, %v1479_v55 }
 0x771   : > { %v1483_v57 = vadd.f32 %v1480_v56, %v2770_v10 }
 0x773   : > { %v1484_v58 = vsel %vm660_vm1, %v1483_v57, 0.0  ;;  %v1495_v59 = vmul.f32 %v1483_v57, %v1483_v57 }
 0x774   : > { %1485 = vadd.xlane.f32.xlu1 %v1484_v58 }
 0x775   : > { %v1496_v60 = vsel %vm660_vm1, %v1495_v59, 0.0 }
 0x776   : > { %1497 = vadd.xlane.f32.xlu0 %v1496_v60 }
 0x7e7   : > { %v1486_v4 = vpop.xlane.xlu1 %1485 }
 0x7e8   : > { %v1494_v7 = vmul.f32 %v1493_v3, %v1486_v4 }
 0x7e9   : > { %v1498_v8 = vpop.xlane.xlu0 %1497 }
 0x7ea   : > { %v1500_v10 = vmul.f32 %v1494_v7, %v1494_v7  ;;  %v1499_v9 = vmul.f32 %v1498_v8, %v1493_v3  ;;  %v1503_v22 = vsub.f32 %v1483_v57, %v1494_v7 }
 0x7ec   : > { %v1501_v13 = vsub.f32 %v1499_v9, %v1500_v10 }
 0x7ee   : > { %v1502_v15 = vmax.f32 %v1501_v13, 0.0 }
 0x7f0   : > { %v1504_v16 = vadd.f32 1e-05, %v1502_v15 }
 0x7f2   : > { %2074 = vrsqrt.f32 %v1504_v16  ;;  %vm1511_vm0 = vweird.f32 %v1504_v16 }
 0x7f8   : > { %v2075_v17 = vpop.eup %2074 }
 0x7f9   : > { %v1506_v18 = vmul.f32 %v2075_v17, %v1504_v16  ;;  %vm1512_vm15 = vweird.f32 %v2075_v17 }
 0x7fa   : > { %vm1513_vm2 = vmor %vm1511_vm0, %vm1512_vm15 }
 0x7fb   : > { %v1507_v5 = vmul.f32 %v2075_v17, %v1506_v18 }
 0x7fd   : > { %v1508_v19 = vmul.f32 0.5, %v1507_v5 }
 0x7ff   : > { %v1509_v20 = vsub.f32 1.5, %v1508_v19 }
 0x801   : > { %v1510_v21 = vmul.f32 %v2075_v17, %v1509_v20 }
 0x803   : > { %v1514_v24 = vsel %vm1513_vm2, %v2075_v17, %v1510_v21 }
 0x804   : > { %v1515_v25 = vmul.f32 %v1514_v24, %v1503_v22 }
 0x806   : > { %v1520_v26 = vmul.f32 %v2038_v23, %v1515_v25  ;;  %1530 = sbr.rel (%p1833_p11) target bundleno = 2067 (0x813), region = 92 }
 0x808   : > { %v1525_v28 = vadd.f32 %v2039_v12, %v1520_v26 }
 0x80a   : > { %1526 = vst.msk [vmem:[#allocation2] sm:$0xff] %vm660_vm1, %v1525_v28 }
 0x811   : > { %v1531_v30 = vld [vmem:[#allocation2] sm:$0xff] }
 0x812   : > { %1532 = vst.msk [vmem:[%s2761_s2] sm:$0xff] %vm660_vm1, %v1531_v30 }
 0x813 PF: > { %s3098_s5 = sld [smem:[#allocation27_spill]]  ;;  %s1546_s0 = sshll.u32 %s2761_s2, 4  ;;  %s1547_s0 = int_to_ptr.vmem [resolvable:$true] %s1546_s0 }
 0x814   : > { %s3100_s19 = sld [smem:[#allocation45_spill]]  ;;  %s1534_s23 = scalar_lea.sflag [#allocation6], %s2697_s13 }
 0x819   : > { %s1835_s25 = sshll.u32 %s3098_s5, 3 }
 0x81a   : > { %s3101_s24 = smov %s3100_s19  ;;  %s1544_s11 = scalar_lea.hbm %s3100_s19, %s1835_s25 }
 0x81b   : > { %s1548_s29 = sshll.u32 %s1544_s11, 4  ;;  %s2276_s16 = scalar_lea.hbm %s3101_s24, 16  ;;  %s1549_s29 = int_to_ptr.hbm [resolvable:$true] %s1548_s29 }
 0x81c   : > { %s2270_s18 = sshra.s32 %s1549_s29, 4  ;;  %s2271_s18 = int_to_ptr.hbm [resolvable:$true] %s2270_s18 }
 0x81d   : > { %s2272_s4 = scalar_lea.hbm %s2271_s18, 8  ;;  %p2277_p7 = scmp.lt.s32.totalorder %s2271_s18, %s3101_s24 }
 0x81e   : > { %p2273_p0 = scmp.ne.s32.totalorder %s2271_s18, %s2272_s4  ;;  %p2278_p12 = scmp.lt.s32.totalorder %s2276_s16, %s2272_s4 }
 0x820   : > { %p2274_p4 = pnand %p2273_p0, %p2553_p8  ;;  %p2279_p13 = por %p2278_p12, %p2277_p7 }
 0x822   : > { %p2275_p5 = pneg %p2274_p4 }
 0x824   : > { %p2280_p1 = pnand %p2279_p13, %p2275_p5 }
 0x826   : > { %2283 = shalt.err (!%p2280_p1)
}
 0x827   : > { %1854 = dma.vmem_to_hbm [thread:$0]  (%p2553_p8), %s1547_s0, 128, %s1549_s29, %s1534_s23  }
 0x828 PF: > { %s3102_s2 = sld [smem:[#allocation29_spill]] }
 0x829   : > { %s3103_s13 = sld [smem:[#allocation24_spill]] }
 0x82e   : > { %p1880_p2 = scmp.ge.s32.totalorder %s3102_s2, 2 }
 0x82f   : > { %s1560_s1 = sand.u32 1, %s3103_s13  }
 0x830   : > { %p1876_p3 = pnand %p1880_p2, %p2557_p9  ;;  %s1561_s28 = scalar_lea.sflag [#allocation6], %s1560_s1 }
 0x832   : > { %p1877_p6 = pneg %p1876_p3 }
 0x834   : > { %2349 = dma.done.wait (%p1877_p6), %s1561_s28, 128  }
 0x835   : > { %2351 = vsyncadd (%p1877_p6), %s1561_s28, 4294967168  ;;  %s35_s23 = sadd.s32 1, %s3102_s2   ;;  %s3105_s13 = sld [smem:[#allocation22_spill]] }
 0x836   : > { %p32_p10 = scmp.ge.s32.totalorder %s35_s23, 6   ;;  %s3106_s14 = sld [smem:[#allocation23_spill]] }
 0x837   : > { %s3107_s15 = sld [smem:[#allocation35_spill]]  ;;  %s3113_s16 = smov %s2370_s17 }
 0x838   : > { %s3108_s27 = sld [smem:[#allocation25_spill]]  ;;  %s3115_s19 = smov %s2386_s21 }
 0x839   : > { %s3109_s18 = sld [smem:[#allocation36_spill]] }
 0x83a   : > { %s3110_s20 = sld [smem:[#allocation28_spill]] }
 0x83b   : > { %s3111_s26 = sld [smem:[#allocation32_spill]] }
 0x83c   : > { %s3112_s22 = sld [smem:[#allocation34_spill]] }
 0x83d   :  { %34 = sbr.rel (!%p32_p10) target bundleno = 25 (0x19), region = 186 }
 0x83e   : > { %s3114_s17 = smov %s3108_s27 }
 0x841   : > { %s3116_s21 = smov %s3111_s26 }
 0x842   :  { %1567 = vsyncpa [#allocation5], 1 }
 0x843   :  { %1569 = vsyncpa [#allocation5 + $0x1], 1 }
 0x844   :  { %1570 = vsyncpa [#allocation8], 1 }
 0x845   :  { %1572 = vsyncpa [#allocation8 + $0x1], 1 }
 0x846   :  { %1573 = vsyncpa [#allocation11], 1 }
 0x847   :  { %1575 = vsyncpa [#allocation11 + $0x1], 1 }
 0x848   :  { %1576 = vsyncpa [#allocation14], 1 }
 0x849   :  { %1578 = vsyncpa [#allocation14 + $0x1], 1 }
 0x84a   :  { %1579 = vsyncpa [#allocation6], 1 }
 0x84b   :  { %1581 = vsyncpa [#allocation6 + $0x1], 1 }

</bundles_post_ra>
